<compile_context>
chip_gen: v5e
topology: v5e:2x2
jax: 0.10.0
libtpu: 0.0.40
codegen_flags: <defaults>
</compile_context>

<pallas_src>
import functools
import math

import jax
import jax.numpy as jnp
from jax.experimental import pallas as pl
from jax.experimental.pallas import tpu as pltpu

LEAKY_SLOPE = 0.01  # torch.nn.LeakyReLU default negative_slope


def _round_up(x, m):
    return ((x + m - 1) // m) * m


def _vmem_budget_bytes():
    """Generation-aware scoped-VMEM budget (leaves headroom for compiler scratch)."""
    try:
        phys = int(pltpu.get_tpu_info().vmem_capacity_bytes)
    except Exception:
        phys = 64 * 1024 * 1024  # conservative: assume the smallest (v7x) VMEM
    if phys <= 64 * 1024 * 1024:
        budget = phys - 12 * 1024 * 1024          # v7x: ~52 MiB usable
    else:
        budget = min(phys - 24 * 1024 * 1024, 104 * 1024 * 1024)  # v5e/v6e
    return max(budget, 32 * 1024 * 1024)


def _make_sdne_kernel(n_layers, n_enc, outs_p):
    """Fused forward: chain of (h @ W + b) -> LeakyReLU over all layers."""

    def kernel(*refs):
        x_ref = refs[0]
        w_refs = refs[1:1 + n_layers]
        b_ref = refs[1 + n_layers]                       # (n_layers, max_N_pad) f32
        emb_ref = refs[2 + n_layers]
        fin_ref = refs[3 + n_layers]

        h = x_ref[...]                                   # compute-dtype tile
        a = None
        for li in range(n_layers):
            w = w_refs[li][...]                          # (K_pad, N_pad)
            z = jnp.dot(h, w, preferred_element_type=jnp.float32)   # MXU, f32 acc
            z = z + b_ref[li:li + 1, :outs_p[li]]        # f32 bias add (VPU)
            a = jnp.maximum(z, LEAKY_SLOPE * z)          # LeakyReLU: single vmax
            if li == n_enc - 1:
                emb_ref[...] = a.astype(emb_ref.dtype)
            h = a.astype(w.dtype)                        # feed next MXU pass
        fin_ref[...] = a.astype(fin_ref.dtype)

    return kernel


def prepare_sdne_params(weights, biases, compute_dtype=jnp.bfloat16):
    """Pad + cast parameters ONCE (hoisted out of the per-call forward).

    weights: list of (in_i, out_i) arrays — encoder layers then mirrored decoder.
    biases:  list of (out_i,) arrays.
    Returns ((padded_weights, packed_bias), dims) with dims = (ins, outs) as
    static metadata for sdne_forward_prepared.
    """
    n_layers = len(weights)
    assert n_layers >= 2 and n_layers % 2 == 0 and n_layers == len(biases)
    ins = tuple(int(w.shape[0]) for w in weights)
    outs = tuple(int(w.shape[1]) for w in weights)
    for i in range(1, n_layers):
        assert ins[i] == outs[i - 1]

    ins_p = [_round_up(d, 128) for d in ins]
    outs_p = [_round_up(d, 128) for d in outs]
    max_np = max(outs_p)

    padded_w = []
    for w, kp, np_ in zip(weights, ins_p, outs_p):
        wc = jnp.asarray(w, compute_dtype)
        padded_w.append(jnp.pad(wc, ((0, kp - wc.shape[0]), (0, np_ - wc.shape[1]))))

    rows = []
    for b in biases:
        b32 = jnp.asarray(b, jnp.float32)
        rows.append(jnp.pad(b32, (0, max_np - b32.shape[0])))
    packed_b = jnp.stack(rows)                           # (n_layers, max_N_pad) f32

    return (tuple(padded_w), packed_b), (ins, outs)


@functools.partial(
    jax.jit, static_argnames=("dims", "block_b", "out_dtype", "interpret"))
def sdne_forward_prepared(x, padded_weights, packed_bias, *, dims, block_b=None,
                          out_dtype=jnp.float32, interpret=False):
    """Pallas forward for SDNENet on pre-padded parameters.

    Returns (embeddings (B, E) out_dtype, final (B, D0) out_dtype).
    """
    ins, outs = dims
    n_layers = len(padded_weights)
    assert n_layers == len(ins) == len(outs)
    n_enc = n_layers // 2

    B, D0 = x.shape
    assert ins[0] == D0 and outs[-1] == D0

    ins_p = tuple(int(w.shape[0]) for w in padded_weights)
    outs_p = tuple(int(w.shape[1]) for w in padded_weights)
    D0_p = ins_p[0]
    E, E_p = outs[n_enc - 1], outs_p[n_enc - 1]
    F, F_p = outs[-1], outs_p[-1]
    max_np = int(packed_bias.shape[1])

    compute_dtype = padded_weights[0].dtype
    c_itemsize = jnp.dtype(compute_dtype).itemsize
    o_itemsize = jnp.dtype(out_dtype).itemsize

    # Single-buffered, constant-index parameters.
    param_bytes = (sum(kp * np_ * c_itemsize for kp, np_ in zip(ins_p, outs_p))
                   + n_layers * max_np * 4)

    budget = _vmem_budget_bytes()
    if param_bytes > budget - 4 * 1024 * 1024:
        # TODO(synk): K/N-tiled large-D0 path (extra "arbitrary" grid axis,
        # f32 accumulator + pl.when init/finalize) for the first/last layers.
        raise ValueError(
            f"Resident parameters ({param_bytes / 2**20:.1f} MiB) exceed the VMEM "
            f"budget ({budget / 2**20:.1f} MiB); large-D0 tiled path not implemented.")

    max_w = max(ins_p + outs_p)

    def tile_bytes(bb):
        # double-buffered x tile + outputs, single-buffered params,
        # f32 + compute-dtype activation temporaries of the widest layer.
        return (2 * bb * D0_p * c_itemsize
                + 2 * bb * (E_p + F_p) * o_itemsize
                + param_bytes
                + 4 * bb * max_w * 4)

    # Batch tile: largest MXU-friendly M that fits the budget (prefer 256-512
    # rows to fill the 256-wide v6e/v7x MXU); as few as 1-2 grid steps is fine.
    if block_b is None:
        block_b = B if B <= 512 else 512
    else:
        block_b = min(int(block_b), B)
    if block_b < B:
        block_b = max(8, (block_b // 8) * 8)             # (8,128) BlockSpec rule
    while block_b > 8 and tile_bytes(block_b) > budget:
        nb = max(8, (block_b // 2 // 8) * 8)
        if nb >= block_b:
            break
        block_b = nb

    # Note: if B % block_b != 0 the last grid step computes on padding rows;
    # rows are independent and OOB output writes are dropped -> still exact.
    grid = (pl.cdiv(B, block_b),)
    vmem_limit = int(min(budget, max(int(1.5 * tile_bytes(block_b)),
                                     32 * 1024 * 1024)))

    # Input activation: cast (and pad only if needed).
    x_c = x if x.dtype == compute_dtype else x.astype(compute_dtype)
    if D0_p != D0:
        x_c = jnp.pad(x_c, ((0, 0), (0, D0_p - D0)))

    single = pl.Buffered(1)  # constant-index params: DMA once, no double buffer
    in_specs = [pl.BlockSpec((block_b, D0_p), lambda i: (i, 0))]          # x tile
    for kp, np_ in zip(ins_p, outs_p):
        in_specs.append(pl.BlockSpec((kp, np_), lambda i: (0, 0),
                                     pipeline_mode=single))               # weight
    in_specs.append(pl.BlockSpec((n_layers, max_np), lambda i: (0, 0),
                                 pipeline_mode=single))                   # biases
    out_specs = (pl.BlockSpec((block_b, E_p), lambda i: (i, 0)),
                 pl.BlockSpec((block_b, F_p), lambda i: (i, 0)))

    cost = pl.CostEstimate(
        flops=2 * B * sum(kp * np_ for kp, np_ in zip(ins_p, outs_p)),
        transcendentals=0,
        bytes_accessed=(B * D0_p * c_itemsize + param_bytes
                        + B * (E_p + F_p) * o_itemsize),
    )

    emb_p, fin_p = pl.pallas_call(
        _make_sdne_kernel(n_layers, n_enc, outs_p),
        out_shape=(jax.ShapeDtypeStruct((B, E_p), out_dtype),
                   jax.ShapeDtypeStruct((B, F_p), out_dtype)),
        grid_spec=pltpu.PrefetchScalarGridSpec(
            num_scalar_prefetch=0,
            grid=grid,
            in_specs=in_specs,
            out_specs=out_specs,
        ),
        compiler_params=pltpu.CompilerParams(
            dimension_semantics=("parallel",),   # batch tiles shard across TCs
            vmem_limit_bytes=vmem_limit,
        ),
        cost_estimate=cost,
        interpret=interpret,
    )(x_c, *padded_weights, packed_bias)

    emb = emb_p if E_p == E else emb_p[:, :E]
    fin = fin_p if F_p == F else fin_p[:, :F]
    return emb, fin


def sdne_forward(x, weights, biases, *, compute_dtype=jnp.bfloat16, **kwargs):
    """Convenience one-shot forward. For repeated calls, call
    prepare_sdne_params once and reuse sdne_forward_prepared."""
    (pw, pb), dims = prepare_sdne_params(weights, biases, compute_dtype)
    return sdne_forward_prepared(x, pw, pb, dims=dims, **kwargs)


def xavier_uniform(key, fan_in, fan_out, dtype=jnp.float32):
    # Matches torch.nn.init.xavier_uniform_ (gain=1) on Linear.weight (out,in).
    a = math.sqrt(6.0 / (fan_in + fan_out))
    return jax.random.uniform(key, (fan_in, fan_out), dtype, -a, a)


if __name__ == "__main__":
    key = jax.random.PRNGKey(0)

    # SDNENet(encoder_layer_list) -> encoder 256->128->64, decoder 64->128->256
    encoder_layer_list = (256, 128, 64)
    B = 256

    dims = list(encoder_layer_list)
    chain = dims + dims[-2::-1]                 # [256, 128, 64, 128, 256]
    keys = jax.random.split(key, len(chain))

    weights, biases = [], []
    for i in range(len(chain) - 1):
        # init_weights(): xavier_uniform_ on weight, bias = 0
        weights.append(xavier_uniform(keys[i], chain[i], chain[i + 1]))
        biases.append(jnp.zeros((chain[i + 1],), jnp.float32))

    x = jax.random.normal(keys[-1], (B, encoder_layer_list[0]), jnp.float32)
    n_enc = len(weights) // 2

    def ref_forward(x, weights, biases, n_enc, cdt):
        h = x
        e = None
        for i, (w, b) in enumerate(zip(weights, biases)):
            z = jnp.dot(h.astype(cdt), w.astype(cdt),
                        preferred_element_type=jnp.float32,
                        precision=jax.lax.Precision.HIGHEST) + b
            h = jnp.where(z >= 0, z, LEAKY_SLOPE * z)
            if i == n_enc - 1:
                e = h
        return e, h

    # --- default (bf16 compute) path; params prepared ONCE, reused ---
    params_bf16, dims_meta = prepare_sdne_params(weights, biases, jnp.bfloat16)
    emb, fin = sdne_forward_prepared(x, *params_bf16, dims=dims_meta)
    emb, fin = jax.block_until_ready((emb, fin))

    emb_ref, fin_ref = ref_forward(x, weights, biases, n_enc, jnp.bfloat16)
    assert emb.shape == (B, encoder_layer_list[-1])
    assert fin.shape == (B, encoder_layer_list[0])
    assert jnp.allclose(emb, emb_ref, atol=1e-3, rtol=1e-3)
    assert jnp.allclose(fin, fin_ref, atol=1e-3, rtol=1e-3)

    # --- f32 parity path (PyTorch-equivalent numerics) + 2-step grid ---
    emb32, fin32 = sdne_forward(x, weights, biases,
                                compute_dtype=jnp.float32, block_b=128)
    emb32, fin32 = jax.block_until_ready((emb32, fin32))
    emb_ref32, fin_ref32 = ref_forward(x, weights, biases, n_enc, jnp.float32)
    assert jnp.allclose(emb32, emb_ref32, atol=1e-3, rtol=1e-3)
    assert jnp.allclose(fin32, fin_ref32, atol=1e-3, rtol=1e-3)

    print("KERNEL_OK")
</pallas_src>

<mosaic_0001>
module attributes {stable_mosaic.version = 11 : i64} {
  func.func @kernel(%arg0: i32, %arg1: memref<256x256xbf16, #tpu.memory_space<vmem>>, %arg2: memref<256x128xbf16, #tpu.memory_space<vmem>>, %arg3: memref<128x128xbf16, #tpu.memory_space<vmem>>, %arg4: memref<128x128xbf16, #tpu.memory_space<vmem>>, %arg5: memref<128x256xbf16, #tpu.memory_space<vmem>>, %arg6: memref<4x256xf32, #tpu.memory_space<vmem>>, %arg7: memref<256x128xf32, #tpu.memory_space<vmem>>, %arg8: memref<256x256xf32, #tpu.memory_space<vmem>>) attributes {dimension_semantics = [#tpu.dimension_semantics<parallel>], iteration_bounds = array<i64: 1>, scalar_prefetch = 0 : i64, scratch_operands = 0 : i64, tpu.core_type = #tpu.core_type<tc>, window_params = [{transform_indices = @transform_0, window_bounds = array<i64: 256, 256>}, {pipeline_mode = #tpu.pipeline_mode<synchronous>, transform_indices = @transform_1, window_bounds = array<i64: 256, 128>}, {pipeline_mode = #tpu.pipeline_mode<synchronous>, transform_indices = @transform_2, window_bounds = array<i64: 128, 128>}, {pipeline_mode = #tpu.pipeline_mode<synchronous>, transform_indices = @transform_3, window_bounds = array<i64: 128, 128>}, {pipeline_mode = #tpu.pipeline_mode<synchronous>, transform_indices = @transform_4, window_bounds = array<i64: 128, 256>}, {pipeline_mode = #tpu.pipeline_mode<synchronous>, transform_indices = @transform_5, window_bounds = array<i64: 4, 256>}, {transform_indices = @transform_6, window_bounds = array<i64: 256, 128>}, {transform_indices = @transform_7, window_bounds = array<i64: 256, 256>}]} {
    %c0 = arith.constant 0 : index
    %c0_0 = arith.constant 0 : index
    %0 = vector.load %arg1[%c0, %c0_0] : memref<256x256xbf16, #tpu.memory_space<vmem>>, vector<256x256xbf16>
    %c0_1 = arith.constant 0 : index
    %c0_2 = arith.constant 0 : index
    %1 = vector.load %arg2[%c0_1, %c0_2] : memref<256x128xbf16, #tpu.memory_space<vmem>>, vector<256x128xbf16>
    %cst = arith.constant dense<0.000000e+00> : vector<256x128xf32>
    %2 = tpu.matmul %0, %1, %cst {dimension_numbers = #tpu.dot_dimension_numbers<[1], [0], [0], [1], [0, 0, 1, 1], [], []>} : vector<256x256xbf16>, vector<256x128xbf16>, vector<256x128xf32> -> vector<256x128xf32>
    %c0_3 = arith.constant 0 : index
    %c0_4 = arith.constant 0 : index
    %3 = vector.load %arg6[%c0_3, %c0_4] : memref<4x256xf32, #tpu.memory_space<vmem>>, vector<1x128xf32>
    %4 = vector.broadcast %3 : vector<1x128xf32> to vector<256x128xf32>
    %5 = arith.addf %2, %4 : vector<256x128xf32>
    %cst_5 = arith.constant 0.00999999977 : f32
    %6 = vector.broadcast %cst_5 : f32 to vector<256x128xf32>
    %7 = arith.mulf %6, %5 : vector<256x128xf32>
    %8 = arith.maximumf %5, %7 : vector<256x128xf32>
    %9 = arith.truncf %8 : vector<256x128xf32> to vector<256x128xbf16>
    %c0_6 = arith.constant 0 : index
    %c0_7 = arith.constant 0 : index
    %10 = vector.load %arg3[%c0_6, %c0_7] : memref<128x128xbf16, #tpu.memory_space<vmem>>, vector<128x128xbf16>
    %cst_8 = arith.constant dense<0.000000e+00> : vector<256x128xf32>
    %11 = tpu.matmul %9, %10, %cst_8 {dimension_numbers = #tpu.dot_dimension_numbers<[1], [0], [0], [1], [0, 0, 1, 1], [], []>} : vector<256x128xbf16>, vector<128x128xbf16>, vector<256x128xf32> -> vector<256x128xf32>
    %c1 = arith.constant 1 : index
    %c0_9 = arith.constant 0 : index
    %12 = vector.load %arg6[%c1, %c0_9] : memref<4x256xf32, #tpu.memory_space<vmem>>, vector<1x128xf32>
    %13 = vector.broadcast %12 : vector<1x128xf32> to vector<256x128xf32>
    %14 = arith.addf %11, %13 : vector<256x128xf32>
    %cst_10 = arith.constant 0.00999999977 : f32
    %15 = vector.broadcast %cst_10 : f32 to vector<256x128xf32>
    %16 = arith.mulf %15, %14 : vector<256x128xf32>
    %17 = arith.maximumf %14, %16 : vector<256x128xf32>
    %c0_11 = arith.constant 0 : index
    %c0_12 = arith.constant 0 : index
    %18 = vector.load %arg7[%c0_11, %c0_12] : memref<256x128xf32, #tpu.memory_space<vmem>>, vector<256x128xf32>
    tpu.vector_store %arg7[%c0_11, %c0_12], %17 {strides = array<i32>} : memref<256x128xf32, #tpu.memory_space<vmem>>, vector<256x128xf32>,
    %19 = arith.truncf %17 : vector<256x128xf32> to vector<256x128xbf16>
    %c0_13 = arith.constant 0 : index
    %c0_14 = arith.constant 0 : index
    %20 = vector.load %arg4[%c0_13, %c0_14] : memref<128x128xbf16, #tpu.memory_space<vmem>>, vector<128x128xbf16>
    %cst_15 = arith.constant dense<0.000000e+00> : vector<256x128xf32>
    %21 = tpu.matmul %19, %20, %cst_15 {dimension_numbers = #tpu.dot_dimension_numbers<[1], [0], [0], [1], [0, 0, 1, 1], [], []>} : vector<256x128xbf16>, vector<128x128xbf16>, vector<256x128xf32> -> vector<256x128xf32>
    %c2 = arith.constant 2 : index
    %c0_16 = arith.constant 0 : index
    %22 = vector.load %arg6[%c2, %c0_16] : memref<4x256xf32, #tpu.memory_space<vmem>>, vector<1x128xf32>
    %23 = vector.broadcast %22 : vector<1x128xf32> to vector<256x128xf32>
    %24 = arith.addf %21, %23 : vector<256x128xf32>
    %cst_17 = arith.constant 0.00999999977 : f32
    %25 = vector.broadcast %cst_17 : f32 to vector<256x128xf32>
    %26 = arith.mulf %25, %24 : vector<256x128xf32>
    %27 = arith.maximumf %24, %26 : vector<256x128xf32>
    %28 = arith.truncf %27 : vector<256x128xf32> to vector<256x128xbf16>
    %c0_18 = arith.constant 0 : index
    %c0_19 = arith.constant 0 : index
    %29 = vector.load %arg5[%c0_18, %c0_19] : memref<128x256xbf16, #tpu.memory_space<vmem>>, vector<128x256xbf16>
    %cst_20 = arith.constant dense<0.000000e+00> : vector<256x256xf32>
    %30 = tpu.matmul %28, %29, %cst_20 {dimension_numbers = #tpu.dot_dimension_numbers<[1], [0], [0], [1], [0, 0, 1, 1], [], []>} : vector<256x128xbf16>, vector<128x256xbf16>, vector<256x256xf32> -> vector<256x256xf32>
    %c3 = arith.constant 3 : index
    %c0_21 = arith.constant 0 : index
    %31 = vector.load %arg6[%c3, %c0_21] : memref<4x256xf32, #tpu.memory_space<vmem>>, vector<1x256xf32>
    %32 = vector.broadcast %31 : vector<1x256xf32> to vector<256x256xf32>
    %33 = arith.addf %30, %32 : vector<256x256xf32>
    %cst_22 = arith.constant 0.00999999977 : f32
    %34 = vector.broadcast %cst_22 : f32 to vector<256x256xf32>
    %35 = arith.mulf %34, %33 : vector<256x256xf32>
    %36 = arith.maximumf %33, %35 : vector<256x256xf32>
    %c0_23 = arith.constant 0 : index
    %c0_24 = arith.constant 0 : index
    %37 = vector.load %arg8[%c0_23, %c0_24] : memref<256x256xf32, #tpu.memory_space<vmem>>, vector<256x256xf32>
    tpu.vector_store %arg8[%c0_23, %c0_24], %36 {strides = array<i32>} : memref<256x256xf32, #tpu.memory_space<vmem>>, vector<256x256xf32>,
    return
  }
  func.func @transform_0(%arg0: i32) -> (i32, i32) {
    %c0_i32 = arith.constant 0 : i32
    %c0_i32_0 = arith.constant 0 : i32
    return %arg0, %c0_i32 : i32, i32
  }
  func.func @transform_1(%arg0: i32) -> (i32, i32) {
    %c0_i32 = arith.constant 0 : i32
    %c0_i32_0 = arith.constant 0 : i32
    %c0_i32_1 = arith.constant 0 : i32
    return %c0_i32, %c0_i32_0 : i32, i32
  }
  func.func @transform_2(%arg0: i32) -> (i32, i32) {
    %c0_i32 = arith.constant 0 : i32
    %c0_i32_0 = arith.constant 0 : i32
    %c0_i32_1 = arith.constant 0 : i32
    return %c0_i32, %c0_i32_0 : i32, i32
  }
  func.func @transform_3(%arg0: i32) -> (i32, i32) {
    %c0_i32 = arith.constant 0 : i32
    %c0_i32_0 = arith.constant 0 : i32
    %c0_i32_1 = arith.constant 0 : i32
    return %c0_i32, %c0_i32_0 : i32, i32
  }
  func.func @transform_4(%arg0: i32) -> (i32, i32) {
    %c0_i32 = arith.constant 0 : i32
    %c0_i32_0 = arith.constant 0 : i32
    %c0_i32_1 = arith.constant 0 : i32
    return %c0_i32, %c0_i32_0 : i32, i32
  }
  func.func @transform_5(%arg0: i32) -> (i32, i32) {
    %c0_i32 = arith.constant 0 : i32
    %c0_i32_0 = arith.constant 0 : i32
    %c0_i32_1 = arith.constant 0 : i32
    return %c0_i32, %c0_i32_0 : i32, i32
  }
  func.func @transform_6(%arg0: i32) -> (i32, i32) {
    %c0_i32 = arith.constant 0 : i32
    %c0_i32_0 = arith.constant 0 : i32
    return %arg0, %c0_i32 : i32, i32
  }
  func.func @transform_7(%arg0: i32) -> (i32, i32) {
    %c0_i32 = arith.constant 0 : i32
    %c0_i32_0 = arith.constant 0 : i32
    return %arg0, %c0_i32 : i32, i32
  }
}

</mosaic_0001>

<bundles_post_ra>
// kernel: sdne_forward_prepared.1
= control target key start
LH: loop header
LB: loop body
LE: loop exit
PB: predicated region body
PF: predicated region fallthrough
CT: control target
= control target key end

     0   :  { %s2808_s0 = inlined_call_operand.vmem [shape: bf16[256,256], index: 0, kind: input, shape index: {}]   ;;  %s2809_s1 = inlined_call_operand.vmem [shape: bf16[256,128], index: 1, kind: input, shape index: {}]   ;;  %s2810_s2 = inlined_call_operand.vmem [shape: bf16[128,128], index: 2, kind: input, shape index: {}]   ;;  %s2811_s3 = inlined_call_operand.vmem [shape: bf16[128,128], index: 3, kind: input, shape index: {}]   ;;  %s2812_s4 = inlined_call_operand.vmem [shape: bf16[128,256], index: 4, kind: input, shape index: {}]   ;;  %s2813_s5 = inlined_call_operand.vmem [shape: f32[4,256], index: 5, kind: input, shape index: {}]   ;;  %s2814_s6 = inlined_call_operand.vmem [shape: f32[256,128], index: 6, kind: output, shape index: {0}]   ;;  %s2815_s7 = inlined_call_operand.hbm [shape: f32[256,256], index: 7, kind: output, shape index: {1}]  }
   0x1   :  { %v1963_v0 = vld [vmem:[%s2809_s1 + $0x38] sm:$0xff]  ;;  %v1962_v2 = vld [vmem:[%s2809_s1 + $0x30] sm:$0xff]  ;;  %v1961_v4 = vld [vmem:[%s2809_s1 + $0x28] sm:$0xff] }
   0x2   :  { %v1971_v1 = vld [vmem:[%s2809_s1 + $0x78] sm:$0xff]  ;;  %348 = vmatpush.bf16.msra.mxu0 %v1963_v0  ;;  %v1970_v3 = vld [vmem:[%s2809_s1 + $0x70] sm:$0xff]  ;;  %2004 = vmatpush.bf16.msra.mxu2 %v1963_v0  ;;  %v1969_v5 = vld [vmem:[%s2809_s1 + $0x68] sm:$0xff] }
   0x3   :  { %437 = vmatpush.bf16.msra.mxu1 %v1971_v1  ;;  %2012 = vmatpush.bf16.msra.mxu3 %v1971_v1 }
   0x6   :  { %349 = vmatpush.bf16.msra.mxu0 %v1962_v2  ;;  %2005 = vmatpush.bf16.msra.mxu2 %v1962_v2 }
   0x7   :  { %438 = vmatpush.bf16.msra.mxu1 %v1970_v3  ;;  %2013 = vmatpush.bf16.msra.mxu3 %v1970_v3 }
   0x8   :  { %13 = vsyncpa [#allocation3], 0  ;;  %v1960_v6 = vld [vmem:[%s2809_s1 + $0x20] sm:$0xff]  ;;  %v1959_v8 = vld [vmem:[%s2809_s1 + $0x18] sm:$0xff]  ;;  %s1589_s24 = sshll.u32 %s2815_s7, 4  ;;  %s2054_s25 = smov 16   ;;  %s1590_s24 = int_to_ptr.hbm [resolvable:$true] %s1589_s24 }
   0x9   :  { %v1968_v7 = vld [vmem:[%s2809_s1 + $0x60] sm:$0xff]  ;;  %v1967_v9 = vld [vmem:[%s2809_s1 + $0x58] sm:$0xff]  ;;  %v1958_v10 = vld [vmem:[%s2809_s1 + $0x10] sm:$0xff] }
   0xa   :  { %350 = vmatpush.bf16.msra.mxu0 %v1961_v4  ;;  %2006 = vmatpush.bf16.msra.mxu2 %v1961_v4  ;;  %v1966_v11 = vld [vmem:[%s2809_s1 + $0x50] sm:$0xff]  ;;  %v1957_v12 = vld [vmem:[%s2809_s1 + $0x8] sm:$0xff]  ;;  %v1956_v14 = vld [vmem:[%s2809_s1] sm:$0xff] }
   0xb   :  { %439 = vmatpush.bf16.msra.mxu1 %v1969_v5  ;;  %2014 = vmatpush.bf16.msra.mxu3 %v1969_v5  ;;  %v1965_v13 = vld [vmem:[%s2809_s1 + $0x48] sm:$0xff]  ;;  %v1964_v15 = vld [vmem:[%s2809_s1 + $0x40] sm:$0xff]  ;;  %v1979_v24 = vld [vmem:[%s2810_s2 + $0x38] sm:$0xff] }
   0xc   :  { %v1605_v16 = vld [vmem:[%s2808_s0] sm:$0xf]  ;;  %v1925_v17 = vld [vmem:[%s2808_s0 + $0x4] sm:$0xf0]  ;;  %v1924_v18 = vld [vmem:[%s2808_s0 + $0x4] sm:$0xf] }
   0xd   :  { %v1607_v19 = vld [vmem:[%s2808_s0 + $0x8] sm:$0xf0]  ;;  %v1669_v20 = vld [vmem:[%s2808_s0 + $0x80] sm:$0xf]  ;;  %v1941_v21 = vld [vmem:[%s2808_s0 + $0x84] sm:$0xf0]  ;;  %v1606_v25 = vor.u32 %v1925_v17, %v1605_v16 }
   0xe   :  { %351 = vmatpush.bf16.msra.mxu0 %v1960_v6  ;;  %2007 = vmatpush.bf16.msra.mxu2 %v1960_v6  ;;  %v1940_v22 = vld [vmem:[%s2808_s0 + $0x84] sm:$0xf]  ;;  %v1671_v23 = vld [vmem:[%s2808_s0 + $0x88] sm:$0xf0]  ;;  %v1610_v26 = vor.u32 %v1924_v18, %v1607_v19  ;;  %v1670_v27 = vor.u32 %v1941_v21, %v1669_v20  ;;  %v1978_v29 = vld [vmem:[%s2810_s2 + $0x30] sm:$0xff] }
   0xf   :  { %440 = vmatpush.bf16.msra.mxu1 %v1968_v7  ;;  %2015 = vmatpush.bf16.msra.mxu3 %v1968_v7  ;;  %v1674_v28 = vor.u32 %v1940_v22, %v1671_v23  ;;  %v1613_v30 = vld [vmem:[%s2808_s0 + $0x10] sm:$0xf]  ;;  %v1927_v31 = vld [vmem:[%s2808_s0 + $0x14] sm:$0xf0]  ;;  %v1926_v32 = vld [vmem:[%s2808_s0 + $0x14] sm:$0xf] }
  0x10   :  { %v1615_v33 = vld [vmem:[%s2808_s0 + $0x18] sm:$0xf0]  ;;  %v1677_v34 = vld [vmem:[%s2808_s0 + $0x90] sm:$0xf]  ;;  %v1943_v35 = vld [vmem:[%s2808_s0 + $0x94] sm:$0xf0]  ;;  %v1614_v38 = vor.u32 %v1927_v31, %v1613_v30 }
  0x11   :  { %v1942_v36 = vld [vmem:[%s2808_s0 + $0x94] sm:$0xf]  ;;  %v1679_v37 = vld [vmem:[%s2808_s0 + $0x98] sm:$0xf0]  ;;  %v1618_v39 = vor.u32 %v1926_v32, %v1615_v33  ;;  %v1678_v40 = vor.u32 %v1943_v35, %v1677_v34  ;;  %v1977_v42 = vld [vmem:[%s2810_s2 + $0x28] sm:$0xff] }
  0x12   :  { %352 = vmatpush.bf16.msra.mxu0 %v1959_v8  ;;  %2008 = vmatpush.bf16.msra.mxu2 %v1959_v8  ;;  %v1682_v41 = vor.u32 %v1942_v36, %v1679_v37  ;;  %v1621_v43 = vld [vmem:[%s2808_s0 + $0x20] sm:$0xf]  ;;  %v1929_v44 = vld [vmem:[%s2808_s0 + $0x24] sm:$0xf0]  ;;  %v1928_v45 = vld [vmem:[%s2808_s0 + $0x24] sm:$0xf] }
  0x13   :  { %441 = vmatpush.bf16.msra.mxu1 %v1967_v9  ;;  %2016 = vmatpush.bf16.msra.mxu3 %v1967_v9  ;;  %v1623_v46 = vld [vmem:[%s2808_s0 + $0x28] sm:$0xf0]  ;;  %v1685_v47 = vld [vmem:[%s2808_s0 + $0xa0] sm:$0xf]  ;;  %v1945_v48 = vld [vmem:[%s2808_s0 + $0xa4] sm:$0xf0]  ;;  %v1622_v51 = vor.u32 %v1929_v44, %v1621_v43 }
  0x14   :  { %v1944_v49 = vld [vmem:[%s2808_s0 + $0xa4] sm:$0xf]  ;;  %v1687_v50 = vld [vmem:[%s2808_s0 + $0xa8] sm:$0xf0]  ;;  %v1626_v52 = vor.u32 %v1928_v45, %v1623_v46  ;;  %v1686_v53 = vor.u32 %v1945_v48, %v1685_v47  ;;  %v1629_v56 = vld [vmem:[%s2808_s0 + $0x30] sm:$0xf] }
  0x15   :  { %v1690_v54 = vor.u32 %v1944_v49, %v1687_v50  ;;  %v1976_v55 = vld [vmem:[%s2810_s2 + $0x20] sm:$0xff]  ;;  %v1931_v57 = vld [vmem:[%s2808_s0 + $0x34] sm:$0xf0]  ;;  %v1930_v58 = vld [vmem:[%s2808_s0 + $0x34] sm:$0xf] }
  0x16   :  { %353 = vmatpush.bf16.msra.mxu0 %v1958_v10  ;;  %2009 = vmatpush.bf16.msra.mxu2 %v1958_v10  ;;  %v1631_v59 = vld [vmem:[%s2808_s0 + $0x38] sm:$0xf0]  ;;  %v1693_v60 = vld [vmem:[%s2808_s0 + $0xb0] sm:$0xf]  ;;  %v1947_v61 = vld [vmem:[%s2808_s0 + $0xb4] sm:$0xf0]  ;;  %v1630_v0 = vor.u32 %v1931_v57, %v1629_v56 }
  0x17   :  { %442 = vmatpush.bf16.msra.mxu1 %v1966_v11  ;;  %2017 = vmatpush.bf16.msra.mxu3 %v1966_v11  ;;  %v1946_v62 = vld [vmem:[%s2808_s0 + $0xb4] sm:$0xf]  ;;  %v1695_v63 = vld [vmem:[%s2808_s0 + $0xb8] sm:$0xf0]  ;;  %v1634_v1 = vor.u32 %v1930_v58, %v1631_v59  ;;  %v1694_v2 = vor.u32 %v1947_v61, %v1693_v60  ;;  %v1637_v5 = vld [vmem:[%s2808_s0 + $0x40] sm:$0xf] }
  0x18   :  { %v1698_v3 = vor.u32 %v1946_v62, %v1695_v63  ;;  %v1975_v4 = vld [vmem:[%s2810_s2 + $0x18] sm:$0xff]  ;;  %v1933_v6 = vld [vmem:[%s2808_s0 + $0x44] sm:$0xf0]  ;;  %v1932_v7 = vld [vmem:[%s2808_s0 + $0x44] sm:$0xf] }
  0x19   :  { %v1639_v8 = vld [vmem:[%s2808_s0 + $0x48] sm:$0xf0]  ;;  %v1701_v9 = vld [vmem:[%s2808_s0 + $0xc0] sm:$0xf]  ;;  %v1949_v10 = vld [vmem:[%s2808_s0 + $0xc4] sm:$0xf0] }
  0x1a   :  { %354 = vmatpush.bf16.msra.mxu0 %v1957_v12  ;;  %2010 = vmatpush.bf16.msra.mxu2 %v1957_v12  ;;  %v1948_v11 = vld [vmem:[%s2808_s0 + $0xc4] sm:$0xf]  ;;  %v1703_v12 = vld [vmem:[%s2808_s0 + $0xc8] sm:$0xf0]  ;;  %v1974_v17 = vld [vmem:[%s2810_s2 + $0x10] sm:$0xff] }
  0x1b   :  { %443 = vmatpush.bf16.msra.mxu1 %v1965_v13  ;;  %2018 = vmatpush.bf16.msra.mxu3 %v1965_v13  ;;  %v1638_v13 = vor.u32 %v1933_v6, %v1637_v5  ;;  %v1706_v16 = vor.u32 %v1948_v11, %v1703_v12  ;;  %v1645_v18 = vld [vmem:[%s2808_s0 + $0x50] sm:$0xf]  ;;  %v1935_v19 = vld [vmem:[%s2808_s0 + $0x54] sm:$0xf0]  ;;  %v1934_v20 = vld [vmem:[%s2808_s0 + $0x54] sm:$0xf] }
  0x1c   :  { %v1647_v21 = vld [vmem:[%s2808_s0 + $0x58] sm:$0xf0]  ;;  %v1709_v22 = vld [vmem:[%s2808_s0 + $0xd0] sm:$0xf]  ;;  %v1951_v23 = vld [vmem:[%s2808_s0 + $0xd4] sm:$0xf0] }
  0x1d   :  { %v1973_v30 = vld [vmem:[%s2810_s2 + $0x8] sm:$0xff]  ;;  %v1653_v31 = vld [vmem:[%s2808_s0 + $0x60] sm:$0xf]  ;;  %v1936_v33 = vld [vmem:[%s2808_s0 + $0x64] sm:$0xf] }
  0x1e   :  { %355 = vmatpush.bf16.msra.mxu0 %v1956_v14  ;;  %2011 = vmatpush.bf16.msra.mxu2 %v1956_v14  ;;  %v1642_v14 = vor.u32 %v1932_v7, %v1639_v8  ;;  %v1937_v32 = vld [vmem:[%s2808_s0 + $0x64] sm:$0xf0]  ;;  %v1655_v34 = vld [vmem:[%s2808_s0 + $0x68] sm:$0xf0]  ;;  %v1717_v35 = vld [vmem:[%s2808_s0 + $0xe0] sm:$0xf] }
  0x1f   :  { %444 = vmatpush.bf16.msra.mxu1 %v1964_v15  ;;  %2019 = vmatpush.bf16.msra.mxu3 %v1964_v15  ;;  %v1702_v15 = vor.u32 %v1949_v10, %v1701_v9  ;;  %v1953_v36 = vld [vmem:[%s2808_s0 + $0xe4] sm:$0xf0]  ;;  %v1952_v37 = vld [vmem:[%s2808_s0 + $0xe4] sm:$0xf]  ;;  %v1661_v44 = vld [vmem:[%s2808_s0 + $0x70] sm:$0xf] }
  0x20   :  { %v1972_v43 = vld [vmem:[%s2810_s2] sm:$0xff]  ;;  %v1939_v45 = vld [vmem:[%s2808_s0 + $0x74] sm:$0xf0]  ;;  %v1938_v46 = vld [vmem:[%s2808_s0 + $0x74] sm:$0xf] }
  0x21   :  { %356 = vmatmul.bf16.vlgmr.msra.gmra.mxu0 %v1606_v25  ;;  %396 = vmatmul.bf16.vlgmr.msra.gmra.mxu2 %v1670_v27  ;;  %v1711_v25 = vld [vmem:[%s2808_s0 + $0xd8] sm:$0xf0]  ;;  %v1650_v27 = vor.u32 %v1934_v20, %v1647_v21  ;;  %v1725_v48 = vld [vmem:[%s2808_s0 + $0xf0] sm:$0xf]  ;;  %v1955_v49 = vld [vmem:[%s2808_s0 + $0xf4] sm:$0xf0] }
  0x22   :  { %672 = vmatpush.bf16.msrb.mxu2 %v1979_v24  ;;  %445 = vmatmul.bf16.vlgmr.msra.gmra.mxu1 %v1610_v26  ;;  %v1950_v24 = vld [vmem:[%s2808_s0 + $0xd4] sm:$0xf]  ;;  %v1646_v26 = vor.u32 %v1935_v19, %v1645_v18  ;;  %v1663_v47 = vld [vmem:[%s2808_s0 + $0x78] sm:$0xf0]  ;;  %v2362_v56 = vld [vmem:[%s2813_s5] ss:$0 sm:$0xff] }
  0x23   :  { %485 = vmatmul.bf16.vlgmr.msra.gmra.mxu3 %v1674_v28  ;;  %v1710_v28 = vor.u32 %v1951_v23, %v1709_v22  ;;  %v1954_v50 = vld [vmem:[%s2808_s0 + $0xf4] sm:$0xf]  ;;  %v1987_v62 = vld [vmem:[%s2811_s3 + $0x38] sm:$0xff] }
  0x24   :  { %939 = vmatpush.bf16.msrb.mxu3 %v1987_v62 }
  0x26   :  { %673 = vmatpush.bf16.msrb.mxu2 %v1978_v29  ;;  %v1714_v29 = vor.u32 %v1950_v24, %v1711_v25 }
  0x2a   :  { %674 = vmatpush.bf16.msrb.mxu2 %v1977_v42 }
  0x2e   :  { %675 = vmatpush.bf16.msrb.mxu2 %v1976_v55 }
  0x31   :  { %361 = vmatmul.bf16.gmra.mxu0 %v1614_v38  ;;  %401 = vmatmul.bf16.gmra.mxu2 %v1678_v40  ;;  %v1719_v38 = vld [vmem:[%s2808_s0 + $0xe8] sm:$0xf0]  ;;  %v1658_v40 = vor.u32 %v1936_v33, %v1655_v34 }
  0x32   :  { %450 = vmatmul.bf16.gmra.mxu1 %v1618_v39  ;;  %676 = vmatpush.bf16.msrb.mxu2 %v1975_v4  ;;  %v1654_v39 = vor.u32 %v1937_v32, %v1653_v31  ;;  %v1722_v42 = vor.u32 %v1952_v37, %v1719_v38 }
  0x33   :  { %490 = vmatmul.bf16.gmra.mxu3 %v1682_v41  ;;  %v1718_v41 = vor.u32 %v1953_v36, %v1717_v35 }
  0x36   :  { %677 = vmatpush.bf16.msrb.mxu2 %v1974_v17 }
  0x3a   :  { %678 = vmatpush.bf16.msrb.mxu2 %v1973_v30  ;;  %v1985_v30 = vld [vmem:[%s2811_s3 + $0x28] sm:$0xff] }
  0x3e   :  { %679 = vmatpush.bf16.msrb.mxu2 %v1972_v43 }
  0x41   :  { %366 = vmatmul.bf16.gmra.mxu0 %v1622_v51  ;;  %406 = vmatmul.bf16.gmra.mxu2 %v1686_v53  ;;  %v1727_v51 = vld [vmem:[%s2808_s0 + $0xf8] sm:$0xf0]  ;;  %v1666_v53 = vor.u32 %v1938_v46, %v1663_v47  ;;  %v1984_v46 = vld [vmem:[%s2811_s3 + $0x20] sm:$0xff] }
  0x42   :  { %455 = vmatmul.bf16.gmra.mxu1 %v1626_v52  ;;  %v1662_v52 = vor.u32 %v1939_v45, %v1661_v44  ;;  %v1730_v55 = vor.u32 %v1954_v50, %v1727_v51 }
  0x43   :  { %495 = vmatmul.bf16.gmra.mxu3 %v1690_v54  ;;  %v1726_v54 = vor.u32 %v1955_v49, %v1725_v48 }
  0x51   :  { %371 = vmatmul.bf16.gmra.mxu0 %v1630_v0  ;;  %411 = vmatmul.bf16.gmra.mxu2 %v1694_v2 }
  0x52   :  { %460 = vmatmul.bf16.gmra.mxu1 %v1634_v1 }
  0x53   :  { %500 = vmatmul.bf16.gmra.mxu3 %v1698_v3 }
  0x61   :  { %376 = vmatmul.bf16.gmra.mxu0 %v1638_v13  ;;  %416 = vmatmul.bf16.gmra.mxu2 %v1702_v15 }
  0x62   :  { %465 = vmatmul.bf16.gmra.mxu1 %v1642_v14  ;;  %v1986_v14 = vld [vmem:[%s2811_s3 + $0x30] sm:$0xff] }
  0x63   :  { %505 = vmatmul.bf16.gmra.mxu3 %v1706_v16 }
  0x64   :  { %940 = vmatpush.bf16.msrb.mxu3 %v1986_v14 }
  0x68   :  { %941 = vmatpush.bf16.msrb.mxu3 %v1985_v30 }
  0x6c   :  { %942 = vmatpush.bf16.msrb.mxu3 %v1984_v46 }
  0x71   :  { %381 = vmatmul.bf16.gmra.mxu0 %v1646_v26  ;;  %421 = vmatmul.bf16.gmra.mxu2 %v1710_v28 }
  0x72   :  { %470 = vmatmul.bf16.gmra.mxu1 %v1650_v27 }
  0x73   :  { %510 = vmatmul.bf16.gmra.mxu3 %v1714_v29 }
  0x81   :  { %386 = vmatmul.bf16.gmra.mxu0 %v1654_v39  ;;  %426 = vmatmul.bf16.gmra.mxu2 %v1718_v41 }
  0x82   :  { %475 = vmatmul.bf16.gmra.mxu1 %v1658_v40 }
  0x83   :  { %515 = vmatmul.bf16.gmra.mxu3 %v1722_v42 }
  0x91   :  { %391 = vmatmul.bf16.gmra.mxu0 %v1662_v52  ;;  %431 = vmatmul.bf16.gmra.mxu2 %v1726_v54 }
  0x92   :  { %480 = vmatmul.bf16.gmra.mxu1 %v1666_v53 }
  0x93   :  { %520 = vmatmul.bf16.gmra.mxu3 %v1730_v55 }
  0x9e   :  { %v357_v57 = vpop.f32.mrf.mxu0 }
  0x9f   :  { %v446_v58 = vpop.f32.mrf.mxu1  ;;  %v358_v59 = vadd.f32 %v2362_v56, %v357_v57 }
  0xa1   :  { %v447_v60 = vadd.f32 %v446_v58, %v358_v59 }
  0xa3   :  { %v526_v2 = vmul.f32 0.01, %v447_v60 }
  0xa4   :  { %v2365_v61 = vpop.f32.mrf.mxu2 }
  0xa5   :  { %v558_v5 = vmax.f32 %v447_v60, %v526_v2 }
  0xa6   :  { %v359_v63 = vpop.f32.mrf.mxu0 }
  0xa7   :  { %v448_v0 = vpop.f32.mrf.mxu1  ;;  %v360_v1 = vadd.f32 %v2362_v56, %v359_v63 }
  0xa9   :  { %v449_v3 = vadd.f32 %v448_v0, %v360_v1  ;;  %v1983_v0 = vld [vmem:[%s2811_s3 + $0x18] sm:$0xff] }
  0xaa   :  { %943 = vmatpush.bf16.msrb.mxu3 %v1983_v0 }
  0xab   :  { %v527_v4 = vmul.f32 0.01, %v449_v3 }
  0xac   :  { %v2371_v7 = vpop.f32.mrf.mxu2 }
  0xad   :  { %v559_v6 = vmax.f32 %v449_v3, %v527_v4 }
  0xae   :  { %v362_v8 = vpop.f32.mrf.mxu0 }
  0xaf   :  { %v451_v9 = vpop.f32.mrf.mxu1  ;;  %v590_v10 = vpack.c.bf16 %v559_v6, %v558_v5  ;;  %v363_v11 = vadd.f32 %v2362_v56, %v362_v8 }
  0xb1   :  { %680 = vmatmul.bf16.vlgmr.msrb.gmra.mxu2 %v590_v10  ;;  %v452_v12 = vadd.f32 %v451_v9, %v363_v11 }
  0xb3   :  { %v528_v18 = vmul.f32 0.01, %v452_v12 }
  0xb4   :  { %v2374_v13 = vpop.f32.mrf.mxu2 }
  0xb5   :  { %v560_v21 = vmax.f32 %v452_v12, %v528_v18 }
  0xb6   :  { %v364_v15 = vpop.f32.mrf.mxu0 }
  0xb7   :  { %v453_v16 = vpop.f32.mrf.mxu1  ;;  %v365_v17 = vadd.f32 %v2362_v56, %v364_v15 }
  0xb9   :  { %v454_v19 = vadd.f32 %v453_v16, %v365_v17  ;;  %v1982_v17 = vld [vmem:[%s2811_s3 + $0x10] sm:$0xff] }
  0xba   :  { %944 = vmatpush.bf16.msrb.mxu3 %v1982_v17 }
  0xbb   :  { %v529_v20 = vmul.f32 0.01, %v454_v19 }
  0xbc   :  { %v2380_v23 = vpop.f32.mrf.mxu2 }
  0xbd   :  { %v561_v22 = vmax.f32 %v454_v19, %v529_v20 }
  0xbe   :  { %v367_v24 = vpop.f32.mrf.mxu0 }
  0xbf   :  { %v456_v25 = vpop.f32.mrf.mxu1  ;;  %v591_v26 = vpack.c.bf16 %v561_v22, %v560_v21  ;;  %v368_v27 = vadd.f32 %v2362_v56, %v367_v24  ;;  %v486_v21 = vpop.f32.mrf.mxu3 }
  0xc1   :  { %685 = vmatmul.bf16.gmra.mxu2 %v591_v26  ;;  %v457_v28 = vadd.f32 %v456_v25, %v368_v27 }
  0xc3   :  { %v530_v34 = vmul.f32 0.01, %v457_v28 }
  0xc4   :  { %v2383_v29 = vpop.f32.mrf.mxu2 }
  0xc5   :  { %v562_v37 = vmax.f32 %v457_v28, %v530_v34 }
  0xc6   :  { %v369_v31 = vpop.f32.mrf.mxu0 }
  0xc7   :  { %v458_v32 = vpop.f32.mrf.mxu1  ;;  %v370_v33 = vadd.f32 %v2362_v56, %v369_v31  ;;  %v488_v34 = vpop.f32.mrf.mxu3 }
  0xc9   :  { %v459_v35 = vadd.f32 %v458_v32, %v370_v33 }
  0xcb   :  { %v531_v36 = vmul.f32 0.01, %v459_v35 }
  0xcc   :  { %v2389_v39 = vpop.f32.mrf.mxu2 }
  0xcd   :  { %v563_v38 = vmax.f32 %v459_v35, %v531_v36  ;;  %v1981_v36 = vld [vmem:[%s2811_s3 + $0x8] sm:$0xff] }
  0xce   :  { %v372_v40 = vpop.f32.mrf.mxu0  ;;  %945 = vmatpush.bf16.msrb.mxu3 %v1981_v36 }
  0xcf   :  { %v461_v41 = vpop.f32.mrf.mxu1  ;;  %v592_v42 = vpack.c.bf16 %v563_v38, %v562_v37  ;;  %v373_v43 = vadd.f32 %v2362_v56, %v372_v40  ;;  %v491_v46 = vpop.f32.mrf.mxu3 }
  0xd1   :  { %690 = vmatmul.bf16.gmra.mxu2 %v592_v42  ;;  %v462_v44 = vadd.f32 %v461_v41, %v373_v43 }
  0xd3   :  { %v532_v50 = vmul.f32 0.01, %v462_v44 }
  0xd4   :  { %v2392_v45 = vpop.f32.mrf.mxu2 }
  0xd5   :  { %v564_v53 = vmax.f32 %v462_v44, %v532_v50 }
  0xd6   :  { %v374_v47 = vpop.f32.mrf.mxu0 }
  0xd7   :  { %v463_v48 = vpop.f32.mrf.mxu1  ;;  %v375_v49 = vadd.f32 %v2362_v56, %v374_v47 }
  0xd9   :  { %v464_v51 = vadd.f32 %v463_v48, %v375_v49 }
  0xdb   :  { %v533_v52 = vmul.f32 0.01, %v464_v51 }
  0xdc   :  { %v2398_v55 = vpop.f32.mrf.mxu2 }
  0xdd   :  { %v565_v54 = vmax.f32 %v464_v51, %v533_v52 }
  0xde   :  { %v377_v57 = vpop.f32.mrf.mxu0 }
  0xdf   :  { %v466_v58 = vpop.f32.mrf.mxu1  ;;  %v593_v59 = vpack.c.bf16 %v565_v54, %v564_v53  ;;  %v378_v60 = vadd.f32 %v2362_v56, %v377_v57 }
  0xe1   :  { %695 = vmatmul.bf16.gmra.mxu2 %v593_v59  ;;  %v467_v62 = vadd.f32 %v466_v58, %v378_v60  ;;  %v493_v58 = vpop.f32.mrf.mxu3 }
  0xe3   :  { %v534_v4 = vmul.f32 0.01, %v467_v62 }
  0xe4   :  { %v2401_v63 = vpop.f32.mrf.mxu2 }
  0xe5   :  { %v566_v8 = vmax.f32 %v467_v62, %v534_v4 }
  0xe6   :  { %v379_v1 = vpop.f32.mrf.mxu0 }
  0xe7   :  { %v468_v2 = vpop.f32.mrf.mxu1  ;;  %v380_v3 = vadd.f32 %v2362_v56, %v379_v1 }
  0xe9   :  { %v469_v5 = vadd.f32 %v468_v2, %v380_v3  ;;  %v1980_v3 = vld [vmem:[%s2811_s3] sm:$0xff]  ;;  %s2053_s3 = smov 256  }
  0xea   :  { %946 = vmatpush.bf16.msrb.mxu3 %v1980_v3 }
  0xeb   :  { %v535_v6 = vmul.f32 0.01, %v469_v5 }
  0xec   :  { %v2407_v14 = vpop.f32.mrf.mxu2 }
  0xed   :  { %v567_v9 = vmax.f32 %v469_v5, %v535_v6  ;;  %v398_v6 = vadd.f32 %v2362_v56, %v2365_v61  ;;  %v403_v61 = vadd.f32 %v2362_v56, %v2374_v13 }
  0xee   :  { %v382_v10 = vpop.f32.mrf.mxu0 }
  0xef   :  { %v471_v11 = vpop.f32.mrf.mxu1  ;;  %v594_v12 = vpack.c.bf16 %v567_v9, %v566_v8  ;;  %v383_v15 = vadd.f32 %v2362_v56, %v382_v10  ;;  %v400_v8 = vadd.f32 %v2362_v56, %v2371_v7  ;;  %v496_v10 = vpop.f32.mrf.mxu3  ;;  %v405_v7 = vadd.f32 %v2362_v56, %v2380_v23  ;;  %v1918_v23 = vld [vmem:[%s2812_s4 + $0x70] sm:$0xf] }
  0xf1   :  { %700 = vmatmul.bf16.gmra.mxu2 %v594_v12  ;;  %v472_v16 = vadd.f32 %v471_v11, %v383_v15  ;;  %v487_v12 = vadd.f32 %v486_v21, %v398_v6  ;;  %v489_v15 = vadd.f32 %v488_v34, %v400_v8  ;;  %v2447_v21 = vld [vmem:[%s2813_s5 + $0x1] ss:$0 sm:$0xff]  ;;  %v2001_v6 = vld [vmem:[%s2812_s4 + $0x64] sm:$0xf0] }
  0xf3   :  { %v536_v22 = vmul.f32 0.01, %v472_v16  ;;  %v543_v17 = vmul.f32 0.01, %v489_v15 }
  0xf4   :  { %v2414_v25 = vpop.f32.mrf.mxu2 }
  0xf5   :  { %v568_v27 = vmax.f32 %v472_v16, %v536_v22  ;;  %v542_v16 = vmul.f32 0.01, %v487_v12 }
  0xf6   :  { %v384_v18 = vpop.f32.mrf.mxu0 }
  0xf7   :  { %v473_v19 = vpop.f32.mrf.mxu1  ;;  %v385_v20 = vadd.f32 %v2362_v56, %v384_v18  ;;  %v574_v18 = vmax.f32 %v487_v12, %v542_v16  ;;  %v1912_v12 = vld [vmem:[%s2812_s4 + $0x68] sm:$0xf0] }
  0xf9   :  { %v474_v24 = vadd.f32 %v473_v19, %v385_v20  ;;  %v575_v19 = vmax.f32 %v489_v15, %v543_v17  ;;  %v498_v20 = vpop.f32.mrf.mxu3  ;;  %v413_v17 = vadd.f32 %v2362_v56, %v2392_v45 }
  0xfb   :  { %v537_v26 = vmul.f32 0.01, %v474_v24 }
  0xfc   :  { %v2417_v35 = vpop.f32.mrf.mxu2 }
  0xfd   :  { %v569_v28 = vmax.f32 %v474_v24, %v537_v26  ;;  %v598_v24 = vpack.c.bf16 %v575_v19, %v574_v18  ;;  %v492_v26 = vadd.f32 %v491_v46, %v403_v61  ;;  %v415_v18 = vadd.f32 %v2362_v56, %v2398_v55 }
  0xfe   :  { %v387_v30 = vpop.f32.mrf.mxu0 }
  0xff   :  { %v476_v31 = vpop.f32.mrf.mxu1  ;;  %v595_v32 = vpack.c.bf16 %v569_v28, %v568_v27  ;;  %v388_v33 = vadd.f32 %v2362_v56, %v387_v30  ;;  %v494_v27 = vadd.f32 %v493_v58, %v405_v7 }
 0x101   :  { %705 = vmatmul.bf16.gmra.mxu2 %v595_v32  ;;  %v477_v37 = vadd.f32 %v476_v31, %v388_v33  ;;  %v501_v31 = vpop.f32.mrf.mxu3  ;;  %v544_v32 = vmul.f32 0.01, %v492_v26  ;;  %v545_v33 = vmul.f32 0.01, %v494_v27 }
 0x102   :  { %v502_v7 = vadd.f32 %v501_v31, %v413_v17  ;;  %v1902_v31 = vld [vmem:[%s2812_s4 + $0x50] sm:$0xf] }
 0x103   :  { %v538_v42 = vmul.f32 0.01, %v477_v37  ;;  %v576_v36 = vmax.f32 %v492_v26, %v544_v32 }
 0x104   :  { %v2423_v49 = vpop.f32.mrf.mxu2  ;;  %v548_v45 = vmul.f32 0.01, %v502_v7 }
 0x105   :  { %v570_v47 = vmax.f32 %v477_v37, %v538_v42  ;;  %v577_v37 = vmax.f32 %v494_v27, %v545_v33 }
 0x106   :  { %v389_v38 = vpop.f32.mrf.mxu0 }
 0x107   :  { %v478_v40 = vpop.f32.mrf.mxu1  ;;  %v390_v41 = vadd.f32 %v2362_v56, %v389_v38  ;;  %v2003_v38 = vld [vmem:[%s2812_s4 + $0x74] sm:$0xf0] }
 0x108   :  { %v1919_v42 = vor.u32 %v2003_v38, %v1918_v23  ;;  %v1998_v38 = vld [vmem:[%s2812_s4 + $0x54] sm:$0xf] }
 0x109   :  { %v479_v43 = vadd.f32 %v478_v40, %v390_v41  ;;  %v2002_v40 = vld [vmem:[%s2812_s4 + $0x74] sm:$0xf] }
 0x10a   :  { %1211 = vmatpush.bf16.msrb.mxu0 %v1919_v42 }
 0x10b   :  { %v539_v44 = vmul.f32 0.01, %v479_v43 }
 0x10c   :  { %v2427_v60 = vpop.f32.mrf.mxu2 }
 0x10d   :  { %v571_v48 = vmax.f32 %v479_v43, %v539_v44  ;;  %v1920_v43 = vld [vmem:[%s2812_s4 + $0x78] sm:$0xf0] }
 0x10e   :  { %v392_v50 = vpop.f32.mrf.mxu0  ;;  %v1923_v46 = vor.u32 %v2002_v40, %v1920_v43  ;;  %v1904_v40 = vld [vmem:[%s2812_s4 + $0x58] sm:$0xf0] }
 0x10f   :  { %v481_v51 = vpop.f32.mrf.mxu1  ;;  %v596_v52 = vpack.c.bf16 %v571_v48, %v570_v47  ;;  %v393_v53 = vadd.f32 %v2362_v56, %v392_v50  ;;  %v408_v47 = vadd.f32 %v2362_v56, %v2383_v29  ;;  %v410_v48 = vadd.f32 %v2362_v56, %v2389_v39 }
 0x110   :  { %1300 = vmatpush.bf16.msrb.mxu1 %v1923_v46  ;;  %v1907_v42 = vor.u32 %v1998_v38, %v1904_v40  ;;  %v420_v46 = vadd.f32 %v2362_v56, %v2407_v14 }
 0x111   :  { %710 = vmatmul.bf16.gmra.mxu2 %v596_v52  ;;  %v482_v54 = vadd.f32 %v481_v51, %v393_v53  ;;  %v599_v51 = vpack.c.bf16 %v577_v37, %v576_v36  ;;  %v503_v52 = vpop.f32.mrf.mxu3  ;;  %v1999_v36 = vld [vmem:[%s2812_s4 + $0x54] sm:$0xf0] }
 0x112   :  { %v1903_v23 = vor.u32 %v1999_v36, %v1902_v31 }
 0x113   :  { %v540_v0 = vmul.f32 0.01, %v482_v54 }
 0x114   :  { %v2436_v11 = vpop.f32.mrf.mxu2 }
 0x115   :  { %v572_v4 = vmax.f32 %v482_v54, %v540_v0  ;;  %v497_v54 = vadd.f32 %v496_v10, %v408_v47  ;;  %v2000_v10 = vld [vmem:[%s2812_s4 + $0x64] sm:$0xf] }
 0x116   :  { %v394_v57 = vpop.f32.mrf.mxu0  ;;  %v1915_v16 = vor.u32 %v2000_v10, %v1912_v12  ;;  %v425_v10 = vadd.f32 %v2362_v56, %v2417_v35 }
 0x117   :  { %v395_v59 = vadd.f32 %v2362_v56, %v394_v57  ;;  %v483_v62 = vpop.f32.mrf.mxu1  ;;  %v499_v57 = vadd.f32 %v498_v20, %v410_v48  ;;  %v546_v29 = vmul.f32 0.01, %v497_v54 }
 0x118   :  { %1301 = vmatpush.bf16.msrb.mxu1 %v1915_v16 }
 0x119   :  { %v484_v1 = vadd.f32 %v483_v62, %v395_v59  ;;  %v547_v0 = vmul.f32 0.01, %v499_v57  ;;  %v578_v3 = vmax.f32 %v497_v54, %v546_v29 }
 0x11b   :  { %v541_v2 = vmul.f32 0.01, %v484_v1 }
 0x11c   :  { %v2438_v22 = vpop.f32.mrf.mxu2  ;;  %1302 = vmatpush.bf16.msrb.mxu1 %v1907_v42 }
 0x11d   :  { %v573_v5 = vmax.f32 %v484_v1, %v541_v2  ;;  %v506_v2 = vpop.f32.mrf.mxu3 }
 0x11f   :  { %v597_v9 = vpack.c.bf16 %v573_v5, %v572_v4  ;;  %v579_v4 = vmax.f32 %v499_v57, %v547_v0  ;;  %v1910_v5 = vld [vmem:[%s2812_s4 + $0x60] sm:$0xf] }
 0x121   :  { %715 = vmatmul.bf16.gmra.mxu2 %v597_v9  ;;  %v1911_v9 = vor.u32 %v2001_v6, %v1910_v5  ;;  %v600_v20 = vpack.c.bf16 %v579_v4, %v578_v3  ;;  %v1996_v4 = vld [vmem:[%s2812_s4 + $0x44] sm:$0xf]  ;;  %v1896_v5 = vld [vmem:[%s2812_s4 + $0x48] sm:$0xf0] }
 0x123   :  { %1212 = vmatpush.bf16.msrb.mxu0 %v1911_v9  ;;  %v423_v9 = vadd.f32 %v2362_v56, %v2414_v25 }
 0x125   :  { %v508_v27 = vpop.f32.mrf.mxu3 }
 0x127   :  { %1213 = vmatpush.bf16.msrb.mxu0 %v1903_v23  ;;  %v430_v23 = vadd.f32 %v2362_v56, %v2427_v60 }
 0x12d   :  { %v511_v43 = vpop.f32.mrf.mxu3 }
 0x131   :  { %720 = vmatmul.bf16.gmra.mxu2 %v598_v24  ;;  %v504_v24 = vadd.f32 %v503_v52, %v415_v18  ;;  %v509_v52 = vadd.f32 %v508_v27, %v420_v46  ;;  %v512_v18 = vadd.f32 %v511_v43, %v423_v9 }
 0x133   :  { %v549_v32 = vmul.f32 0.01, %v504_v24  ;;  %v552_v25 = vmul.f32 0.01, %v512_v18 }
 0x134   :  { %v681_v28 = vpop.f32.mrf.mxu2 }
 0x135   :  { %v682_v30 = vadd.f32 %v2447_v21, %v681_v28  ;;  %v513_v14 = vpop.f32.mrf.mxu3  ;;  %v584_v27 = vmax.f32 %v512_v18, %v552_v25  ;;  %v1991_v18 = vld [vmem:[%s2812_s4 + $0x14] sm:$0xf0] }
 0x137   :  { %v761_v34 = vmul.f32 0.01, %v682_v30 }
 0x139   :  { %v793_v13 = vmax.f32 %v682_v30, %v761_v34  ;;  %v580_v34 = vmax.f32 %v502_v7, %v548_v45  ;;  %v1995_v45 = vld [vmem:[%s2812_s4 + $0x34] sm:$0xf0] }
 0x13b   :  { %825 = vst [vmem:[%s2814_s6] sm:$0xff] %v793_v13 }
 0x13c   :  { %v683_v41 = vpop.f32.mrf.mxu2 }
 0x13d   :  { %v684_v44 = vadd.f32 %v2447_v21, %v683_v41  ;;  %v516_v17 = vpop.f32.mrf.mxu3 }
 0x13f   :  { %v762_v50 = vmul.f32 0.01, %v684_v44 }
 0x141   :  { %v794_v53 = vmax.f32 %v684_v44, %v762_v50  ;;  %725 = vmatmul.bf16.gmra.mxu2 %v599_v51  ;;  %v418_v44 = vadd.f32 %v2362_v56, %v2401_v63 }
 0x143   :  { %826 = vst [vmem:[%s2814_s6 + $0x8] sm:$0xff] %v794_v53  ;;  %v857_v58 = vpack.c.bf16 %v794_v53, %v793_v13  ;;  %v581_v13 = vmax.f32 %v504_v24, %v549_v32  ;;  %v507_v51 = vadd.f32 %v506_v2, %v418_v44 }
 0x144   :  { %v686_v59 = vpop.f32.mrf.mxu2 }
 0x145   :  { %v687_v62 = vadd.f32 %v2447_v21, %v686_v59  ;;  %947 = vmatmul.bf16.vlgmr.msrb.gmra.mxu3 %v857_v58  ;;  %v601_v48 = vpack.c.bf16 %v581_v13, %v580_v34  ;;  %v550_v63 = vmul.f32 0.01, %v507_v51  ;;  %v551_v58 = vmul.f32 0.01, %v509_v52  ;;  %v518_v32 = vpop.f32.mrf.mxu3  ;;  %v1994_v34 = vld [vmem:[%s2812_s4 + $0x34] sm:$0xf] }
 0x146   :  { %v1888_v13 = vld [vmem:[%s2812_s4 + $0x38] sm:$0xf0]  ;;  %v519_v43 = vadd.f32 %v518_v32, %v430_v23  ;;  %v1864_v23 = vld [vmem:[%s2812_s4 + $0x8] sm:$0xf0] }
 0x147   :  { %v763_v39 = vmul.f32 0.01, %v687_v62  ;;  %v582_v29 = vmax.f32 %v507_v51, %v550_v63  ;;  %v583_v0 = vmax.f32 %v509_v52, %v551_v58  ;;  %v1891_v36 = vor.u32 %v1994_v34, %v1888_v13  ;;  %v1862_v13 = vld [vmem:[%s2812_s4] sm:$0xf] }
 0x149   :  { %v795_v1 = vmax.f32 %v687_v62, %v763_v39  ;;  %v1894_v39 = vld [vmem:[%s2812_s4 + $0x40] sm:$0xf] }
 0x14b   :  { %827 = vst [vmem:[%s2814_s6 + $0x10] sm:$0xff] %v795_v1 }
 0x14c   :  { %v688_v8 = vpop.f32.mrf.mxu2 }
 0x14d   :  { %v689_v15 = vadd.f32 %v2447_v21, %v688_v8  ;;  %v1899_v8 = vor.u32 %v1996_v4, %v1896_v5 }
 0x14f   :  { %v764_v19 = vmul.f32 0.01, %v689_v15  ;;  %1303 = vmatpush.bf16.msrb.mxu1 %v1899_v8 }
 0x151   :  { %730 = vmatmul.bf16.gmra.mxu2 %v600_v20  ;;  %v796_v61 = vmax.f32 %v689_v15, %v764_v19  ;;  %v602_v15 = vpack.c.bf16 %v583_v0, %v582_v29  ;;  %v514_v19 = vadd.f32 %v513_v14, %v425_v10  ;;  %v1880_v14 = vld [vmem:[%s2812_s4 + $0x28] sm:$0xf0]  ;;  %v433_v0 = vadd.f32 %v2362_v56, %v2436_v11 }
 0x153   :  { %828 = vst [vmem:[%s2814_s6 + $0x18] sm:$0xff] %v796_v61  ;;  %v858_v26 = vpack.c.bf16 %v796_v61, %v795_v1  ;;  %v1997_v1 = vld [vmem:[%s2812_s4 + $0x44] sm:$0xf0]  ;;  %v553_v24 = vmul.f32 0.01, %v514_v19  ;;  %1304 = vmatpush.bf16.msrb.mxu1 %v1891_v36 }
 0x154   :  { %v691_v28 = vpop.f32.mrf.mxu2  ;;  %v1895_v3 = vor.u32 %v1997_v1, %v1894_v39  ;;  %v435_v39 = vadd.f32 %v2362_v56, %v2438_v22  ;;  %v1988_v36 = vld [vmem:[%s2812_s4 + $0x4] sm:$0xf] }
 0x155   :  { %v692_v30 = vadd.f32 %v2447_v21, %v691_v28  ;;  %952 = vmatmul.bf16.gmra.mxu3 %v858_v26  ;;  %v585_v28 = vmax.f32 %v514_v19, %v553_v24 }
 0x156   :  { %1214 = vmatpush.bf16.msrb.mxu0 %v1895_v3 }
 0x157   :  { %v765_v55 = vmul.f32 0.01, %v692_v30  ;;  %v603_v40 = vpack.c.bf16 %v585_v28, %v584_v27 }
 0x159   :  { %v797_v33 = vmax.f32 %v692_v30, %v765_v55  ;;  %v1886_v30 = vld [vmem:[%s2812_s4 + $0x30] sm:$0xf] }
 0x15b   :  { %829 = vst [vmem:[%s2814_s6 + $0x20] sm:$0xff] %v797_v33 }
 0x15c   :  { %v693_v37 = vpop.f32.mrf.mxu2 }
 0x15d   :  { %v694_v41 = vadd.f32 %v2447_v21, %v693_v37  ;;  %v428_v37 = vadd.f32 %v2362_v56, %v2423_v49  ;;  %v521_v49 = vpop.f32.mrf.mxu3 }
 0x15e   :  { %v522_v5 = vadd.f32 %v521_v49, %v433_v0 }
 0x15f   :  { %v766_v47 = vmul.f32 0.01, %v694_v41  ;;  %v517_v42 = vadd.f32 %v516_v17, %v428_v37  ;;  %v1870_v17 = vld [vmem:[%s2812_s4 + $0x10] sm:$0xf] }
 0x160   :  { %v556_v11 = vmul.f32 0.01, %v522_v5 }
 0x161   :  { %735 = vmatmul.bf16.gmra.mxu2 %v601_v48  ;;  %v798_v50 = vmax.f32 %v694_v41, %v766_v47  ;;  %v554_v48 = vmul.f32 0.01, %v517_v42 }
 0x163   :  { %830 = vst [vmem:[%s2814_s6 + $0x28] sm:$0xff] %v798_v50  ;;  %v859_v53 = vpack.c.bf16 %v798_v50, %v797_v33  ;;  %v1887_v33 = vor.u32 %v1995_v45, %v1886_v30  ;;  %v555_v50 = vmul.f32 0.01, %v519_v43  ;;  %v586_v52 = vmax.f32 %v517_v42, %v554_v48 }
 0x164   :  { %v696_v54 = vpop.f32.mrf.mxu2 }
 0x165   :  { %v697_v57 = vadd.f32 %v2447_v21, %v696_v54  ;;  %957 = vmatmul.bf16.gmra.mxu3 %v859_v53  ;;  %1215 = vmatpush.bf16.msrb.mxu0 %v1887_v33  ;;  %v587_v53 = vmax.f32 %v519_v43, %v555_v50  ;;  %v1878_v54 = vld [vmem:[%s2812_s4 + $0x20] sm:$0xf]  ;;  %v523_v3 = vpop.f32.mrf.mxu3 }
 0x167   :  { %v767_v59 = vmul.f32 0.01, %v697_v57 }
 0x169   :  { %v799_v62 = vmax.f32 %v697_v57, %v767_v59  ;;  %v1993_v57 = vld [vmem:[%s2812_s4 + $0x24] sm:$0xf0]  ;;  %v1992_v59 = vld [vmem:[%s2812_s4 + $0x24] sm:$0xf] }
 0x16a   :  { %v1879_v58 = vor.u32 %v1993_v57, %v1878_v54  ;;  %v1883_v29 = vor.u32 %v1992_v59, %v1880_v14 }
 0x16b   :  { %831 = vst [vmem:[%s2814_s6 + $0x30] sm:$0xff] %v799_v62 }
 0x16c   :  { %v698_v2 = vpop.f32.mrf.mxu2  ;;  %1216 = vmatpush.bf16.msrb.mxu0 %v1879_v58  ;;  %1305 = vmatpush.bf16.msrb.mxu1 %v1883_v29  ;;  %v2645_v58 = vld [vmem:[%s2813_s5 + $0x2] ss:$0 sm:$0xff] }
 0x16d   :  { %v699_v6 = vadd.f32 %v2447_v21, %v698_v2  ;;  %v604_v2 = vpack.c.bf16 %v587_v53, %v586_v52 }
 0x16f   :  { %v768_v12 = vmul.f32 0.01, %v699_v6 }
 0x171   :  { %740 = vmatmul.bf16.gmra.mxu2 %v602_v15  ;;  %v800_v16 = vmax.f32 %v699_v6, %v768_v12  ;;  %v524_v6 = vadd.f32 %v523_v3, %v435_v39  ;;  %v588_v15 = vmax.f32 %v522_v5, %v556_v11 }
 0x173   :  { %832 = vst [vmem:[%s2814_s6 + $0x38] sm:$0xff] %v800_v16  ;;  %v860_v20 = vpack.c.bf16 %v800_v16, %v799_v62  ;;  %v557_v12 = vmul.f32 0.01, %v524_v6 }
 0x174   :  { %v701_v61 = vpop.f32.mrf.mxu2 }
 0x175   :  { %v702_v7 = vadd.f32 %v2447_v21, %v701_v61  ;;  %962 = vmatmul.bf16.gmra.mxu3 %v860_v20  ;;  %v589_v16 = vmax.f32 %v524_v6, %v557_v12  ;;  %v1871_v20 = vor.u32 %v1991_v18, %v1870_v17  ;;  %v1990_v61 = vld [vmem:[%s2812_s4 + $0x14] sm:$0xf] }
 0x177   :  { %v769_v35 = vmul.f32 0.01, %v702_v7  ;;  %1217 = vmatpush.bf16.msrb.mxu0 %v1871_v20 }
 0x179   :  { %v801_v26 = vmax.f32 %v702_v7, %v769_v35  ;;  %v1872_v7 = vld [vmem:[%s2812_s4 + $0x18] sm:$0xf0] }
 0x17a   :  { %v1875_v24 = vor.u32 %v1990_v61, %v1872_v7 }
 0x17b   :  { %833 = vst [vmem:[%s2814_s6 + $0x40] sm:$0xff] %v801_v26 }
 0x17c   :  { %v703_v55 = vpop.f32.mrf.mxu2  ;;  %1306 = vmatpush.bf16.msrb.mxu1 %v1875_v24 }
 0x17d   :  { %v704_v31 = vadd.f32 %v2447_v21, %v703_v55 }
 0x17f   :  { %v770_v38 = vmul.f32 0.01, %v704_v31 }
 0x181   :  { %v802_v41 = vmax.f32 %v704_v31, %v770_v38  ;;  %745 = vmatmul.bf16.gmra.mxu2 %v603_v40  ;;  %v1989_v31 = vld [vmem:[%s2812_s4 + $0x4] sm:$0xf0]  ;;  %v1867_v40 = vor.u32 %v1988_v36, %v1864_v23 }
 0x182   :  { %v1863_v37 = vor.u32 %v1989_v31, %v1862_v13 }
 0x183   :  { %834 = vst [vmem:[%s2814_s6 + $0x48] sm:$0xff] %v802_v41  ;;  %v861_v44 = vpack.c.bf16 %v802_v41, %v801_v26  ;;  %v605_v26 = vpack.c.bf16 %v589_v16, %v588_v15  ;;  %1307 = vmatpush.bf16.msrb.mxu1 %v1867_v40 }
 0x184   :  { %v706_v46 = vpop.f32.mrf.mxu2  ;;  %1218 = vmatpush.bf16.msrb.mxu0 %v1863_v37 }
 0x185   :  { %v707_v47 = vadd.f32 %v2447_v21, %v706_v46  ;;  %967 = vmatmul.bf16.gmra.mxu3 %v861_v44 }
 0x187   :  { %v771_v60 = vmul.f32 0.01, %v707_v47 }
 0x189   :  { %v803_v51 = vmax.f32 %v707_v47, %v771_v60 }
 0x18b   :  { %835 = vst [vmem:[%s2814_s6 + $0x50] sm:$0xff] %v803_v51 }
 0x18c   :  { %v708_v63 = vpop.f32.mrf.mxu2 }
 0x18d   :  { %v709_v62 = vadd.f32 %v2447_v21, %v708_v63 }
 0x18f   :  { %v772_v1 = vmul.f32 0.01, %v709_v62 }
 0x191   :  { %v804_v4 = vmax.f32 %v709_v62, %v772_v1  ;;  %750 = vmatmul.bf16.gmra.mxu2 %v604_v2 }
 0x193   :  { %836 = vst [vmem:[%s2814_s6 + $0x58] sm:$0xff] %v804_v4  ;;  %v862_v8 = vpack.c.bf16 %v804_v4, %v803_v51 }
 0x194   :  { %v711_v9 = vpop.f32.mrf.mxu2 }
 0x195   :  { %v712_v10 = vadd.f32 %v2447_v21, %v711_v9  ;;  %972 = vmatmul.bf16.gmra.mxu3 %v862_v8 }
 0x197   :  { %v773_v56 = vmul.f32 0.01, %v712_v10 }
 0x199   :  { %v805_v22 = vmax.f32 %v712_v10, %v773_v56 }
 0x19b   :  { %837 = vst [vmem:[%s2814_s6 + $0x60] sm:$0xff] %v805_v22 }
 0x19c   :  { %v713_v19 = vpop.f32.mrf.mxu2 }
 0x19d   :  { %v714_v25 = vadd.f32 %v2447_v21, %v713_v19 }
 0x19f   :  { %v774_v35 = vmul.f32 0.01, %v714_v25 }
 0x1a1   :  { %v806_v27 = vmax.f32 %v714_v25, %v774_v35  ;;  %755 = vmatmul.bf16.gmra.mxu2 %v605_v26 }
 0x1a3   :  { %838 = vst [vmem:[%s2814_s6 + $0x68] sm:$0xff] %v806_v27  ;;  %v863_v28 = vpack.c.bf16 %v806_v27, %v805_v22 }
 0x1a4   :  { %v716_v30 = vpop.f32.mrf.mxu2 }
 0x1a5   :  { %v717_v45 = vadd.f32 %v2447_v21, %v716_v30  ;;  %977 = vmatmul.bf16.gmra.mxu3 %v863_v28 }
 0x1a7   :  { %v775_v32 = vmul.f32 0.01, %v717_v45 }
 0x1a9   :  { %v807_v55 = vmax.f32 %v717_v45, %v775_v32 }
 0x1ab   :  { %839 = vst [vmem:[%s2814_s6 + $0x70] sm:$0xff] %v807_v55 }
 0x1ac   :  { %v718_v33 = vpop.f32.mrf.mxu2 }
 0x1ad   :  { %v719_v34 = vadd.f32 %v2447_v21, %v718_v33 }
 0x1af   :  { %v776_v38 = vmul.f32 0.01, %v719_v34 }
 0x1b1   :  { %v808_v41 = vmax.f32 %v719_v34, %v776_v38 }
 0x1b3   :  { %840 = vst [vmem:[%s2814_s6 + $0x78] sm:$0xff] %v808_v41  ;;  %v864_v42 = vpack.c.bf16 %v808_v41, %v807_v55 }
 0x1b4   :  { %v721_v43 = vpop.f32.mrf.mxu2 }
 0x1b5   :  { %v722_v44 = vadd.f32 %v2447_v21, %v721_v43  ;;  %982 = vmatmul.bf16.gmra.mxu3 %v864_v42 }
 0x1b7   :  { %v777_v46 = vmul.f32 0.01, %v722_v44 }
 0x1b9   :  { %v809_v47 = vmax.f32 %v722_v44, %v777_v46 }
 0x1bb   :  { %841 = vst [vmem:[%s2814_s6 + $0x80] sm:$0xff] %v809_v47 }
 0x1bc   :  { %v723_v49 = vpop.f32.mrf.mxu2 }
 0x1bd   :  { %v724_v48 = vadd.f32 %v2447_v21, %v723_v49 }
 0x1bf   :  { %v778_v50 = vmul.f32 0.01, %v724_v48 }
 0x1c1   :  { %v810_v60 = vmax.f32 %v724_v48, %v778_v50 }
 0x1c3   :  { %842 = vst [vmem:[%s2814_s6 + $0x88] sm:$0xff] %v810_v60  ;;  %v865_v51 = vpack.c.bf16 %v810_v60, %v809_v47 }
 0x1c4   :  { %v726_v52 = vpop.f32.mrf.mxu2 }
 0x1c5   :  { %v727_v53 = vadd.f32 %v2447_v21, %v726_v52  ;;  %987 = vmatmul.bf16.gmra.mxu3 %v865_v51 }
 0x1c7   :  { %v779_v54 = vmul.f32 0.01, %v727_v53 }
 0x1c8   :  { %v948_v57 = vpop.f32.mrf.mxu3 }
 0x1c9   :  { %v811_v63 = vmax.f32 %v727_v53, %v779_v54  ;;  %v949_v14 = vadd.f32 %v2645_v58, %v948_v57 }
 0x1cb   :  { %843 = vst [vmem:[%s2814_s6 + $0x90] sm:$0xff] %v811_v63  ;;  %v1028_v39 = vmul.f32 0.01, %v949_v14 }
 0x1cc   :  { %v728_v59 = vpop.f32.mrf.mxu2 }
 0x1cd   :  { %v729_v62 = vadd.f32 %v2447_v21, %v728_v59  ;;  %v1060_v6 = vmax.f32 %v949_v14, %v1028_v39 }
 0x1cf   :  { %v780_v29 = vmul.f32 0.01, %v729_v62 }
 0x1d0   :  { %v950_v0 = vpop.f32.mrf.mxu3 }
 0x1d1   :  { %v812_v1 = vmax.f32 %v729_v62, %v780_v29  ;;  %v951_v2 = vadd.f32 %v2645_v58, %v950_v0 }
 0x1d3   :  { %844 = vst [vmem:[%s2814_s6 + $0x98] sm:$0xff] %v812_v1  ;;  %v1029_v3 = vmul.f32 0.01, %v951_v2  ;;  %v866_v4 = vpack.c.bf16 %v812_v1, %v811_v63 }
 0x1d4   :  { %v731_v5 = vpop.f32.mrf.mxu2 }
 0x1d5   :  { %v1061_v8 = vmax.f32 %v951_v2, %v1029_v3  ;;  %v732_v9 = vadd.f32 %v2447_v21, %v731_v5  ;;  %992 = vmatmul.bf16.gmra.mxu3 %v866_v4 }
 0x1d7   :  { %v781_v10 = vmul.f32 0.01, %v732_v9  ;;  %v1092_v11 = vpack.c.bf16 %v1061_v8, %v1060_v6 }
 0x1d8   :  { %v953_v12 = vpop.f32.mrf.mxu3 }
 0x1d9   :  { %v813_v56 = vmax.f32 %v732_v9, %v781_v10  ;;  %1219 = vmatmul.bf16.vlgmr.msrb.gmra.mxu0 %v1092_v11  ;;  %1308 = vmatmul.bf16.vlgmr.msrb.gmra.mxu1 %v1092_v11  ;;  %v954_v15 = vadd.f32 %v2645_v58, %v953_v12 }
 0x1db   :  { %845 = vst [vmem:[%s2814_s6 + $0xa0] sm:$0xff] %v813_v56  ;;  %v1030_v19 = vmul.f32 0.01, %v954_v15 }
 0x1dc   :  { %v733_v22 = vpop.f32.mrf.mxu2 }
 0x1dd   :  { %v734_v16 = vadd.f32 %v2447_v21, %v733_v22  ;;  %v1062_v35 = vmax.f32 %v954_v15, %v1030_v19 }
 0x1df   :  { %v782_v17 = vmul.f32 0.01, %v734_v16 }
 0x1e0   :  { %v955_v18 = vpop.f32.mrf.mxu3 }
 0x1e1   :  { %v814_v20 = vmax.f32 %v734_v16, %v782_v17  ;;  %v956_v61 = vadd.f32 %v2645_v58, %v955_v18 }
 0x1e3   :  { %846 = vst [vmem:[%s2814_s6 + $0xa8] sm:$0xff] %v814_v20  ;;  %v1031_v7 = vmul.f32 0.01, %v956_v61  ;;  %v867_v25 = vpack.c.bf16 %v814_v20, %v813_v56 }
 0x1e4   :  { %v736_v24 = vpop.f32.mrf.mxu2 }
 0x1e5   :  { %v737_v26 = vadd.f32 %v2447_v21, %v736_v24  ;;  %997 = vmatmul.bf16.gmra.mxu3 %v867_v25  ;;  %v1063_v27 = vmax.f32 %v956_v61, %v1031_v7 }
 0x1e7   :  { %v783_v28 = vmul.f32 0.01, %v737_v26  ;;  %v1093_v30 = vpack.c.bf16 %v1063_v27, %v1062_v35 }
 0x1e8   :  { %v958_v45 = vpop.f32.mrf.mxu3 }
 0x1e9   :  { %v815_v32 = vmax.f32 %v737_v26, %v783_v28  ;;  %1224 = vmatmul.bf16.gmra.mxu0 %v1093_v30  ;;  %1313 = vmatmul.bf16.gmra.mxu1 %v1093_v30  ;;  %v959_v33 = vadd.f32 %v2645_v58, %v958_v45 }
 0x1eb   :  { %847 = vst [vmem:[%s2814_s6 + $0xb0] sm:$0xff] %v815_v32  ;;  %v1032_v36 = vmul.f32 0.01, %v959_v33 }
 0x1ec   :  { %v738_v55 = vpop.f32.mrf.mxu2 }
 0x1ed   :  { %v739_v34 = vadd.f32 %v2447_v21, %v738_v55  ;;  %v1064_v42 = vmax.f32 %v959_v33, %v1032_v36 }
 0x1ef   :  { %v784_v13 = vmul.f32 0.01, %v739_v34 }
 0x1f0   :  { %v960_v31 = vpop.f32.mrf.mxu3 }
 0x1f1   :  { %v816_v37 = vmax.f32 %v739_v34, %v784_v13  ;;  %v961_v23 = vadd.f32 %v2645_v58, %v960_v31 }
 0x1f3   :  { %848 = vst [vmem:[%s2814_s6 + $0xb8] sm:$0xff] %v816_v37  ;;  %v1033_v38 = vmul.f32 0.01, %v961_v23  ;;  %v868_v40 = vpack.c.bf16 %v816_v37, %v815_v32 }
 0x1f4   :  { %v741_v41 = vpop.f32.mrf.mxu2 }
 0x1f5   :  { %v742_v43 = vadd.f32 %v2447_v21, %v741_v41  ;;  %1002 = vmatmul.bf16.gmra.mxu3 %v868_v40  ;;  %v1065_v44 = vmax.f32 %v961_v23, %v1033_v38 }
 0x1f7   :  { %v785_v46 = vmul.f32 0.01, %v742_v43  ;;  %v1094_v47 = vpack.c.bf16 %v1065_v44, %v1064_v42 }
 0x1f8   :  { %v963_v49 = vpop.f32.mrf.mxu3 }
 0x1f9   :  { %v817_v48 = vmax.f32 %v742_v43, %v785_v46  ;;  %1229 = vmatmul.bf16.gmra.mxu0 %v1094_v47  ;;  %1318 = vmatmul.bf16.gmra.mxu1 %v1094_v47  ;;  %v964_v60 = vadd.f32 %v2645_v58, %v963_v49 }
 0x1fb   :  { %849 = vst [vmem:[%s2814_s6 + $0xc0] sm:$0xff] %v817_v48  ;;  %v1034_v54 = vmul.f32 0.01, %v964_v60 }
 0x1fc   :  { %v743_v50 = vpop.f32.mrf.mxu2 }
 0x1fd   :  { %v744_v51 = vadd.f32 %v2447_v21, %v743_v50  ;;  %v1066_v29 = vmax.f32 %v964_v60, %v1034_v54 }
 0x1ff   :  { %v786_v52 = vmul.f32 0.01, %v744_v51 }
 0x200   :  { %v965_v53 = vpop.f32.mrf.mxu3 }
 0x201   :  { %v818_v57 = vmax.f32 %v744_v51, %v786_v52  ;;  %v966_v63 = vadd.f32 %v2645_v58, %v965_v53 }
 0x203   :  { %850 = vst [vmem:[%s2814_s6 + $0xc8] sm:$0xff] %v818_v57  ;;  %v1035_v59 = vmul.f32 0.01, %v966_v63  ;;  %v869_v14 = vpack.c.bf16 %v818_v57, %v817_v48 }
 0x204   :  { %v746_v62 = vpop.f32.mrf.mxu2 }
 0x205   :  { %v747_v0 = vadd.f32 %v2447_v21, %v746_v62  ;;  %1007 = vmatmul.bf16.gmra.mxu3 %v869_v14  ;;  %v1067_v39 = vmax.f32 %v966_v63, %v1035_v59 }
 0x207   :  { %v787_v1 = vmul.f32 0.01, %v747_v0  ;;  %v1095_v2 = vpack.c.bf16 %v1067_v39, %v1066_v29 }
 0x208   :  { %v968_v3 = vpop.f32.mrf.mxu3 }
 0x209   :  { %v819_v4 = vmax.f32 %v747_v0, %v787_v1  ;;  %1234 = vmatmul.bf16.gmra.mxu0 %v1095_v2  ;;  %1323 = vmatmul.bf16.gmra.mxu1 %v1095_v2  ;;  %v969_v6 = vadd.f32 %v2645_v58, %v968_v3  ;;  %v1859_v3 = vld [vmem:[%s2813_s5 + $0x3] ss:$4 sm:$0x3]  ;;  %s2052_s5 = smov [#allocation2]  }
 0x20a   :  { %s1587_s21 = sshll.u32 %s2052_s5, 4  ;;  %s1588_s21 = int_to_ptr.vmem [resolvable:$true] %s1587_s21 }
 0x20b   :  { %851 = vst [vmem:[%s2814_s6 + $0xd0] sm:$0xff] %v819_v4  ;;  %v1036_v11 = vmul.f32 0.01, %v969_v6 }
 0x20c   :  { %v748_v5 = vpop.f32.mrf.mxu2 }
 0x20d   :  { %v749_v8 = vadd.f32 %v2447_v21, %v748_v5  ;;  %v1068_v17 = vmax.f32 %v969_v6, %v1036_v11 }
 0x20f   :  { %v788_v9 = vmul.f32 0.01, %v749_v8 }
 0x210   :  { %v970_v10 = vpop.f32.mrf.mxu3 }
 0x211   :  { %v820_v12 = vmax.f32 %v749_v8, %v788_v9  ;;  %v971_v56 = vadd.f32 %v2645_v58, %v970_v10  ;;  %v2723_v8 = vperm.slane %v1859_v3, 0  ;;  %v2725_v9 = vperm.slane %v1859_v3, 1 }
 0x213   :  { %852 = vst [vmem:[%s2814_s6 + $0xd8] sm:$0xff] %v820_v12  ;;  %v1037_v22 = vmul.f32 0.01, %v971_v56  ;;  %v870_v15 = vpack.c.bf16 %v820_v12, %v819_v4 }
 0x214   :  { %v751_v16 = vpop.f32.mrf.mxu2 }
 0x215   :  { %v1069_v18 = vmax.f32 %v971_v56, %v1037_v22  ;;  %v752_v19 = vadd.f32 %v2447_v21, %v751_v16  ;;  %1012 = vmatmul.bf16.gmra.mxu3 %v870_v15 }
 0x217   :  { %v789_v20 = vmul.f32 0.01, %v752_v19  ;;  %v1096_v61 = vpack.c.bf16 %v1069_v18, %v1068_v17 }
 0x218   :  { %v973_v7 = vpop.f32.mrf.mxu3 }
 0x219   :  { %v821_v25 = vmax.f32 %v752_v19, %v789_v20  ;;  %1239 = vmatmul.bf16.gmra.mxu0 %v1096_v61  ;;  %1328 = vmatmul.bf16.gmra.mxu1 %v1096_v61  ;;  %v974_v35 = vadd.f32 %v2645_v58, %v973_v7 }
 0x21b   :  { %853 = vst [vmem:[%s2814_s6 + $0xe0] sm:$0xff] %v821_v25  ;;  %v1038_v30 = vmul.f32 0.01, %v974_v35 }
 0x21c   :  { %v753_v24 = vpop.f32.mrf.mxu2 }
 0x21d   :  { %v754_v26 = vadd.f32 %v2447_v21, %v753_v24  ;;  %v1070_v13 = vmax.f32 %v974_v35, %v1038_v30 }
 0x21f   :  { %v790_v27 = vmul.f32 0.01, %v754_v26 }
 0x220   :  { %v975_v28 = vpop.f32.mrf.mxu3 }
 0x221   :  { %v822_v45 = vmax.f32 %v754_v26, %v790_v27  ;;  %v976_v32 = vadd.f32 %v2645_v58, %v975_v28 }
 0x223   :  { %854 = vst [vmem:[%s2814_s6 + $0xe8] sm:$0xff] %v822_v45  ;;  %v1039_v55 = vmul.f32 0.01, %v976_v32  ;;  %v871_v33 = vpack.c.bf16 %v822_v45, %v821_v25 }
 0x224   :  { %v756_v34 = vpop.f32.mrf.mxu2 }
 0x225   :  { %v1071_v31 = vmax.f32 %v976_v32, %v1039_v55  ;;  %v757_v36 = vadd.f32 %v2447_v21, %v756_v34  ;;  %1017 = vmatmul.bf16.gmra.mxu3 %v871_v33 }
 0x227   :  { %v791_v37 = vmul.f32 0.01, %v757_v36  ;;  %v1097_v23 = vpack.c.bf16 %v1071_v31, %v1070_v13 }
 0x228   :  { %v978_v38 = vpop.f32.mrf.mxu3 }
 0x229   :  { %v823_v40 = vmax.f32 %v757_v36, %v791_v37  ;;  %1244 = vmatmul.bf16.gmra.mxu0 %v1097_v23  ;;  %1333 = vmatmul.bf16.gmra.mxu1 %v1097_v23  ;;  %v979_v42 = vadd.f32 %v2645_v58, %v978_v38 }
 0x22b   :  { %855 = vst [vmem:[%s2814_s6 + $0xf0] sm:$0xff] %v823_v40  ;;  %v1040_v47 = vmul.f32 0.01, %v979_v42 }
 0x22c   :  { %v758_v41 = vpop.f32.mrf.mxu2 }
 0x22d   :  { %v759_v43 = vadd.f32 %v2447_v21, %v758_v41  ;;  %v1072_v51 = vmax.f32 %v979_v42, %v1040_v47 }
 0x22f   :  { %v792_v44 = vmul.f32 0.01, %v759_v43 }
 0x230   :  { %v980_v46 = vpop.f32.mrf.mxu3 }
 0x231   :  { %v824_v49 = vmax.f32 %v759_v43, %v792_v44  ;;  %v981_v48 = vadd.f32 %v2645_v58, %v980_v46 }
 0x233   :  { %856 = vst [vmem:[%s2814_s6 + $0xf8] sm:$0xff] %v824_v49  ;;  %v1041_v50 = vmul.f32 0.01, %v981_v48  ;;  %v872_v60 = vpack.c.bf16 %v824_v49, %v823_v40 }
 0x235   :  { %v1073_v52 = vmax.f32 %v981_v48, %v1041_v50  ;;  %1022 = vmatmul.bf16.gmra.mxu3 %v872_v60 }
 0x237   :  { %v1098_v53 = vpack.c.bf16 %v1073_v52, %v1072_v51 }
 0x238   :  { %v983_v54 = vpop.f32.mrf.mxu3 }
 0x239   :  { %1249 = vmatmul.bf16.gmra.mxu0 %v1098_v53  ;;  %1338 = vmatmul.bf16.gmra.mxu1 %v1098_v53  ;;  %v984_v21 = vadd.f32 %v2645_v58, %v983_v54 }
 0x23b   :  { %v1042_v63 = vmul.f32 0.01, %v984_v21 }
 0x23d   :  { %v1074_v62 = vmax.f32 %v984_v21, %v1042_v63 }
 0x240   :  { %v985_v57 = vpop.f32.mrf.mxu3 }
 0x241   :  { %v986_v59 = vadd.f32 %v2645_v58, %v985_v57 }
 0x243   :  { %v1043_v14 = vmul.f32 0.01, %v986_v59 }
 0x245   :  { %v1075_v29 = vmax.f32 %v986_v59, %v1043_v14 }
 0x247   :  { %v1099_v0 = vpack.c.bf16 %v1075_v29, %v1074_v62 }
 0x248   :  { %v988_v39 = vpop.f32.mrf.mxu3 }
 0x249   :  { %1254 = vmatmul.bf16.gmra.mxu0 %v1099_v0  ;;  %1343 = vmatmul.bf16.gmra.mxu1 %v1099_v0  ;;  %v989_v1 = vadd.f32 %v2645_v58, %v988_v39 }
 0x24b   :  { %v1044_v4 = vmul.f32 0.01, %v989_v1 }
 0x24d   :  { %v1076_v10 = vmax.f32 %v989_v1, %v1044_v4 }
 0x250   :  { %v990_v2 = vpop.f32.mrf.mxu3 }
 0x251   :  { %v991_v5 = vadd.f32 %v2645_v58, %v990_v2 }
 0x253   :  { %v1045_v6 = vmul.f32 0.01, %v991_v5 }
 0x255   :  { %v1077_v11 = vmax.f32 %v991_v5, %v1045_v6 }
 0x256   :  { %v1220_v12 = vpop.f32.mrf.mxu0  ;;  %v1309_v56 = vpop.f32.mrf.mxu1 }
 0x257   :  { %v1221_v22 = vadd.f32 %v1220_v12, %v2723_v8  ;;  %v1310_v15 = vadd.f32 %v1309_v56, %v2725_v9  ;;  %v1100_v16 = vpack.c.bf16 %v1077_v11, %v1076_v10 }
 0x258   :  { %v993_v17 = vpop.f32.mrf.mxu3 }
 0x259   :  { %v1389_v18 = vmul.f32 0.01, %v1221_v22  ;;  %v1390_v19 = vmul.f32 0.01, %v1310_v15  ;;  %1259 = vmatmul.bf16.gmra.mxu0 %v1100_v16  ;;  %1348 = vmatmul.bf16.gmra.mxu1 %v1100_v16  ;;  %v994_v7 = vadd.f32 %v2645_v58, %v993_v17 }
 0x25b   :  { %v1453_v20 = vmax.f32 %v1221_v22, %v1389_v18  ;;  %v1454_v61 = vmax.f32 %v1310_v15, %v1390_v19  ;;  %v1046_v28 = vmul.f32 0.01, %v994_v7 }
 0x25d   :  { %1517 = vst [vmem:[#allocation2] sm:$0xff] %v1453_v20  ;;  %v1078_v13 = vmax.f32 %v994_v7, %v1046_v28 }
 0x25e   :  { %1518 = vst [vmem:[#allocation2 + $0x8] sm:$0xff] %v1454_v61  ;;  %v1222_v25 = vpop.f32.mrf.mxu0  ;;  %v1311_v24 = vpop.f32.mrf.mxu1 }
 0x25f   :  { %v1223_v35 = vadd.f32 %v1222_v25, %v2723_v8  ;;  %v1312_v26 = vadd.f32 %v1311_v24, %v2725_v9 }
 0x260   :  { %v995_v27 = vpop.f32.mrf.mxu3 }
 0x261   :  { %v1391_v30 = vmul.f32 0.01, %v1223_v35  ;;  %v1392_v45 = vmul.f32 0.01, %v1312_v26  ;;  %v996_v32 = vadd.f32 %v2645_v58, %v995_v27 }
 0x263   :  { %v1455_v55 = vmax.f32 %v1223_v35, %v1391_v30  ;;  %v1456_v33 = vmax.f32 %v1312_v26, %v1392_v45  ;;  %v1047_v34 = vmul.f32 0.01, %v996_v32 }
 0x265   :  { %1519 = vst [vmem:[#allocation2 + $0x10] sm:$0xff] %v1455_v55  ;;  %v1079_v31 = vmax.f32 %v996_v32, %v1047_v34 }
 0x266   :  { %1520 = vst [vmem:[#allocation2 + $0x18] sm:$0xff] %v1456_v33  ;;  %v1225_v36 = vpop.f32.mrf.mxu0  ;;  %v1314_v37 = vpop.f32.mrf.mxu1 }
 0x267   :  { %v1226_v23 = vadd.f32 %v1225_v36, %v2723_v8  ;;  %v1315_v38 = vadd.f32 %v1314_v37, %v2725_v9  ;;  %v1101_v40 = vpack.c.bf16 %v1079_v31, %v1078_v13 }
 0x268   :  { %v998_v41 = vpop.f32.mrf.mxu3 }
 0x269   :  { %v1393_v42 = vmul.f32 0.01, %v1226_v23  ;;  %v1394_v43 = vmul.f32 0.01, %v1315_v38  ;;  %1264 = vmatmul.bf16.gmra.mxu0 %v1101_v40  ;;  %1353 = vmatmul.bf16.gmra.mxu1 %v1101_v40  ;;  %v999_v47 = vadd.f32 %v2645_v58, %v998_v41 }
 0x26b   :  { %v1457_v44 = vmax.f32 %v1226_v23, %v1393_v42  ;;  %v1458_v46 = vmax.f32 %v1315_v38, %v1394_v43  ;;  %v1048_v52 = vmul.f32 0.01, %v999_v47 }
 0x26d   :  { %1521 = vst [vmem:[#allocation2 + $0x20] sm:$0xff] %v1457_v44  ;;  %v1080_v14 = vmax.f32 %v999_v47, %v1048_v52 }
 0x26e   :  { %1522 = vst [vmem:[#allocation2 + $0x28] sm:$0xff] %v1458_v46  ;;  %v1227_v49 = vpop.f32.mrf.mxu0  ;;  %v1316_v48 = vpop.f32.mrf.mxu1 }
 0x26f   :  { %v1228_v50 = vadd.f32 %v1227_v49, %v2723_v8  ;;  %v1317_v60 = vadd.f32 %v1316_v48, %v2725_v9 }
 0x270   :  { %v1000_v51 = vpop.f32.mrf.mxu3 }
 0x271   :  { %v1395_v53 = vmul.f32 0.01, %v1228_v50  ;;  %v1396_v54 = vmul.f32 0.01, %v1317_v60  ;;  %v1001_v21 = vadd.f32 %v2645_v58, %v1000_v51 }
 0x273   :  { %v1459_v57 = vmax.f32 %v1228_v50, %v1395_v53  ;;  %v1460_v63 = vmax.f32 %v1317_v60, %v1396_v54  ;;  %v1049_v59 = vmul.f32 0.01, %v1001_v21 }
 0x275   :  { %1523 = vst [vmem:[#allocation2 + $0x30] sm:$0xff] %v1459_v57  ;;  %v1081_v62 = vmax.f32 %v1001_v21, %v1049_v59 }
 0x276   :  { %1524 = vst [vmem:[#allocation2 + $0x38] sm:$0xff] %v1460_v63  ;;  %v1230_v29 = vpop.f32.mrf.mxu0  ;;  %v1319_v0 = vpop.f32.mrf.mxu1 }
 0x277   :  { %v1231_v39 = vadd.f32 %v1230_v29, %v2723_v8  ;;  %v1320_v1 = vadd.f32 %v1319_v0, %v2725_v9  ;;  %v1102_v2 = vpack.c.bf16 %v1081_v62, %v1080_v14 }
 0x278   :  { %v1003_v3 = vpop.f32.mrf.mxu3 }
 0x279   :  { %v1397_v4 = vmul.f32 0.01, %v1231_v39  ;;  %v1398_v5 = vmul.f32 0.01, %v1320_v1  ;;  %1269 = vmatmul.bf16.gmra.mxu0 %v1102_v2  ;;  %1358 = vmatmul.bf16.gmra.mxu1 %v1102_v2  ;;  %v1004_v11 = vadd.f32 %v2645_v58, %v1003_v3 }
 0x27b   :  { %v1461_v6 = vmax.f32 %v1231_v39, %v1397_v4  ;;  %v1462_v10 = vmax.f32 %v1320_v1, %v1398_v5  ;;  %v1050_v17 = vmul.f32 0.01, %v1004_v11 }
 0x27d   :  { %1525 = vst [vmem:[#allocation2 + $0x40] sm:$0xff] %v1461_v6  ;;  %v1082_v24 = vmax.f32 %v1004_v11, %v1050_v17 }
 0x27e   :  { %1526 = vst [vmem:[#allocation2 + $0x48] sm:$0xff] %v1462_v10  ;;  %v1232_v12 = vpop.f32.mrf.mxu0  ;;  %v1321_v56 = vpop.f32.mrf.mxu1 }
 0x27f   :  { %v1233_v22 = vadd.f32 %v1232_v12, %v2723_v8  ;;  %v1322_v15 = vadd.f32 %v1321_v56, %v2725_v9 }
 0x280   :  { %v1005_v16 = vpop.f32.mrf.mxu3 }
 0x281   :  { %v1399_v18 = vmul.f32 0.01, %v1233_v22  ;;  %v1400_v19 = vmul.f32 0.01, %v1322_v15  ;;  %v1006_v20 = vadd.f32 %v2645_v58, %v1005_v16 }
 0x283   :  { %v1463_v61 = vmax.f32 %v1233_v22, %v1399_v18  ;;  %v1464_v7 = vmax.f32 %v1322_v15, %v1400_v19  ;;  %v1051_v25 = vmul.f32 0.01, %v1006_v20 }
 0x285   :  { %1527 = vst [vmem:[#allocation2 + $0x50] sm:$0xff] %v1463_v61  ;;  %v1083_v35 = vmax.f32 %v1006_v20, %v1051_v25 }
 0x286   :  { %1528 = vst [vmem:[#allocation2 + $0x58] sm:$0xff] %v1464_v7  ;;  %v1235_v26 = vpop.f32.mrf.mxu0  ;;  %v1324_v27 = vpop.f32.mrf.mxu1 }
 0x287   :  { %v1236_v28 = vadd.f32 %v1235_v26, %v2723_v8  ;;  %v1325_v30 = vadd.f32 %v1324_v27, %v2725_v9  ;;  %v1103_v45 = vpack.c.bf16 %v1083_v35, %v1082_v24 }
 0x288   :  { %v1008_v32 = vpop.f32.mrf.mxu3 }
 0x289   :  { %v1401_v55 = vmul.f32 0.01, %v1236_v28  ;;  %v1402_v33 = vmul.f32 0.01, %v1325_v30  ;;  %1274 = vmatmul.bf16.gmra.mxu0 %v1103_v45  ;;  %1363 = vmatmul.bf16.gmra.mxu1 %v1103_v45  ;;  %v1009_v31 = vadd.f32 %v2645_v58, %v1008_v32 }
 0x28b   :  { %v1465_v34 = vmax.f32 %v1236_v28, %v1401_v55  ;;  %v1466_v13 = vmax.f32 %v1325_v30, %v1402_v33  ;;  %v1052_v41 = vmul.f32 0.01, %v1009_v31 }
 0x28d   :  { %1529 = vst [vmem:[#allocation2 + $0x60] sm:$0xff] %v1465_v34  ;;  %v1084_v48 = vmax.f32 %v1009_v31, %v1052_v41 }
 0x28e   :  { %1530 = vst [vmem:[#allocation2 + $0x68] sm:$0xff] %v1466_v13  ;;  %v1237_v36 = vpop.f32.mrf.mxu0  ;;  %v1326_v37 = vpop.f32.mrf.mxu1 }
 0x28f   :  { %v1238_v23 = vadd.f32 %v1237_v36, %v2723_v8  ;;  %v1327_v38 = vadd.f32 %v1326_v37, %v2725_v9 }
 0x290   :  { %v1010_v40 = vpop.f32.mrf.mxu3 }
 0x291   :  { %v1403_v42 = vmul.f32 0.01, %v1238_v23  ;;  %v1404_v43 = vmul.f32 0.01, %v1327_v38  ;;  %v1011_v44 = vadd.f32 %v2645_v58, %v1010_v40 }
 0x293   :  { %v1467_v46 = vmax.f32 %v1238_v23, %v1403_v42  ;;  %v1468_v47 = vmax.f32 %v1327_v38, %v1404_v43  ;;  %v1053_v49 = vmul.f32 0.01, %v1011_v44 }
 0x295   :  { %1531 = vst [vmem:[#allocation2 + $0x70] sm:$0xff] %v1467_v46  ;;  %v1085_v50 = vmax.f32 %v1011_v44, %v1053_v49 }
 0x296   :  { %1532 = vst [vmem:[#allocation2 + $0x78] sm:$0xff] %v1468_v47  ;;  %v1240_v60 = vpop.f32.mrf.mxu0  ;;  %v1329_v51 = vpop.f32.mrf.mxu1 }
 0x297   :  { %v1241_v52 = vadd.f32 %v1240_v60, %v2723_v8  ;;  %v1330_v53 = vadd.f32 %v1329_v51, %v2725_v9  ;;  %v1104_v54 = vpack.c.bf16 %v1085_v50, %v1084_v48 }
 0x298   :  { %v1013_v21 = vpop.f32.mrf.mxu3 }
 0x299   :  { %v1405_v57 = vmul.f32 0.01, %v1241_v52  ;;  %v1406_v63 = vmul.f32 0.01, %v1330_v53  ;;  %1279 = vmatmul.bf16.gmra.mxu0 %v1104_v54  ;;  %1368 = vmatmul.bf16.gmra.mxu1 %v1104_v54  ;;  %v1014_v62 = vadd.f32 %v2645_v58, %v1013_v21 }
 0x29b   :  { %v1469_v59 = vmax.f32 %v1241_v52, %v1405_v57  ;;  %v1470_v14 = vmax.f32 %v1330_v53, %v1406_v63  ;;  %v1054_v3 = vmul.f32 0.01, %v1014_v62 }
 0x29d   :  { %1533 = vst [vmem:[#allocation2 + $0x80] sm:$0xff] %v1469_v59  ;;  %v1086_v56 = vmax.f32 %v1014_v62, %v1054_v3 }
 0x29e   :  { %1534 = vst [vmem:[#allocation2 + $0x88] sm:$0xff] %v1470_v14  ;;  %v1242_v29 = vpop.f32.mrf.mxu0  ;;  %v1331_v0 = vpop.f32.mrf.mxu1 }
 0x29f   :  { %v1243_v39 = vadd.f32 %v1242_v29, %v2723_v8  ;;  %v1332_v1 = vadd.f32 %v1331_v0, %v2725_v9 }
 0x2a0   :  { %v1015_v2 = vpop.f32.mrf.mxu3 }
 0x2a1   :  { %v1407_v4 = vmul.f32 0.01, %v1243_v39  ;;  %v1408_v5 = vmul.f32 0.01, %v1332_v1  ;;  %v1016_v6 = vadd.f32 %v2645_v58, %v1015_v2 }
 0x2a3   :  { %v1471_v10 = vmax.f32 %v1243_v39, %v1407_v4  ;;  %v1472_v11 = vmax.f32 %v1332_v1, %v1408_v5  ;;  %v1055_v12 = vmul.f32 0.01, %v1016_v6 }
 0x2a5   :  { %1535 = vst [vmem:[#allocation2 + $0x90] sm:$0xff] %v1471_v10  ;;  %v1087_v22 = vmax.f32 %v1016_v6, %v1055_v12 }
 0x2a6   :  { %1536 = vst [vmem:[#allocation2 + $0x98] sm:$0xff] %v1472_v11  ;;  %v1245_v15 = vpop.f32.mrf.mxu0  ;;  %v1334_v16 = vpop.f32.mrf.mxu1 }
 0x2a7   :  { %v1246_v17 = vadd.f32 %v1245_v15, %v2723_v8  ;;  %v1335_v18 = vadd.f32 %v1334_v16, %v2725_v9  ;;  %v1105_v19 = vpack.c.bf16 %v1087_v22, %v1086_v56 }
 0x2a8   :  { %v1018_v20 = vpop.f32.mrf.mxu3 }
 0x2a9   :  { %v1409_v61 = vmul.f32 0.01, %v1246_v17  ;;  %v1410_v7 = vmul.f32 0.01, %v1335_v18  ;;  %1284 = vmatmul.bf16.gmra.mxu0 %v1105_v19  ;;  %1373 = vmatmul.bf16.gmra.mxu1 %v1105_v19  ;;  %v1019_v35 = vadd.f32 %v2645_v58, %v1018_v20 }
 0x2ab   :  { %v1473_v25 = vmax.f32 %v1246_v17, %v1409_v61  ;;  %v1474_v24 = vmax.f32 %v1335_v18, %v1410_v7  ;;  %v1056_v32 = vmul.f32 0.01, %v1019_v35 }
 0x2ad   :  { %1537 = vst [vmem:[#allocation2 + $0xa0] sm:$0xff] %v1473_v25  ;;  %v1088_v37 = vmax.f32 %v1019_v35, %v1056_v32 }
 0x2ae   :  { %1538 = vst [vmem:[#allocation2 + $0xa8] sm:$0xff] %v1474_v24  ;;  %v1247_v26 = vpop.f32.mrf.mxu0  ;;  %v1336_v27 = vpop.f32.mrf.mxu1 }
 0x2af   :  { %v1248_v28 = vadd.f32 %v1247_v26, %v2723_v8  ;;  %v1337_v30 = vadd.f32 %v1336_v27, %v2725_v9 }
 0x2b0   :  { %v1020_v45 = vpop.f32.mrf.mxu3 }
 0x2b1   :  { %v1411_v55 = vmul.f32 0.01, %v1248_v28  ;;  %v1412_v33 = vmul.f32 0.01, %v1337_v30  ;;  %v1021_v34 = vadd.f32 %v2645_v58, %v1020_v45 }
 0x2b3   :  { %v1475_v13 = vmax.f32 %v1248_v28, %v1411_v55  ;;  %v1476_v31 = vmax.f32 %v1337_v30, %v1412_v33  ;;  %v1057_v36 = vmul.f32 0.01, %v1021_v34 }
 0x2b5   :  { %1539 = vst [vmem:[#allocation2 + $0xb0] sm:$0xff] %v1475_v13  ;;  %v1089_v23 = vmax.f32 %v1021_v34, %v1057_v36 }
 0x2b6   :  { %1540 = vst [vmem:[#allocation2 + $0xb8] sm:$0xff] %v1476_v31  ;;  %v1250_v38 = vpop.f32.mrf.mxu0  ;;  %v1339_v40 = vpop.f32.mrf.mxu1 }
 0x2b7   :  { %v1251_v41 = vadd.f32 %v1250_v38, %v2723_v8  ;;  %v1340_v42 = vadd.f32 %v1339_v40, %v2725_v9  ;;  %v1106_v43 = vpack.c.bf16 %v1089_v23, %v1088_v37 }
 0x2b8   :  { %v1023_v44 = vpop.f32.mrf.mxu3 }
 0x2b9   :  { %v1413_v46 = vmul.f32 0.01, %v1251_v41  ;;  %v1414_v47 = vmul.f32 0.01, %v1340_v42  ;;  %1289 = vmatmul.bf16.gmra.mxu0 %v1106_v43  ;;  %1378 = vmatmul.bf16.gmra.mxu1 %v1106_v43  ;;  %v1024_v50 = vadd.f32 %v2645_v58, %v1023_v44 }
 0x2bb   :  { %v1477_v49 = vmax.f32 %v1251_v41, %v1413_v46  ;;  %v1478_v48 = vmax.f32 %v1340_v42, %v1414_v47  ;;  %v1058_v21 = vmul.f32 0.01, %v1024_v50 }
 0x2bd   :  { %1541 = vst [vmem:[#allocation2 + $0xc0] sm:$0xff] %v1477_v49  ;;  %v1090_v0 = vmax.f32 %v1024_v50, %v1058_v21 }
 0x2be   :  { %1542 = vst [vmem:[#allocation2 + $0xc8] sm:$0xff] %v1478_v48  ;;  %v1252_v60 = vpop.f32.mrf.mxu0  ;;  %v1341_v51 = vpop.f32.mrf.mxu1 }
 0x2bf   :  { %v1253_v52 = vadd.f32 %v1252_v60, %v2723_v8  ;;  %v1342_v53 = vadd.f32 %v1341_v51, %v2725_v9 }
 0x2c0   :  { %v1025_v54 = vpop.f32.mrf.mxu3 }
 0x2c1   :  { %v1415_v57 = vmul.f32 0.01, %v1253_v52  ;;  %v1416_v63 = vmul.f32 0.01, %v1342_v53  ;;  %v1026_v59 = vadd.f32 %v2645_v58, %v1025_v54 }
 0x2c3   :  { %v1479_v14 = vmax.f32 %v1253_v52, %v1415_v57  ;;  %v1480_v62 = vmax.f32 %v1342_v53, %v1416_v63  ;;  %v1059_v29 = vmul.f32 0.01, %v1026_v59 }
 0x2c5   :  { %1543 = vst [vmem:[#allocation2 + $0xd0] sm:$0xff] %v1479_v14  ;;  %v1091_v39 = vmax.f32 %v1026_v59, %v1059_v29 }
 0x2c6   :  { %1544 = vst [vmem:[#allocation2 + $0xd8] sm:$0xff] %v1480_v62  ;;  %v1255_v1 = vpop.f32.mrf.mxu0  ;;  %v1344_v2 = vpop.f32.mrf.mxu1 }
 0x2c7   :  { %v1256_v3 = vadd.f32 %v1255_v1, %v2723_v8  ;;  %v1345_v4 = vadd.f32 %v1344_v2, %v2725_v9  ;;  %v1107_v5 = vpack.c.bf16 %v1091_v39, %v1090_v0 }
 0x2c9   :  { %v1417_v6 = vmul.f32 0.01, %v1256_v3  ;;  %v1418_v10 = vmul.f32 0.01, %v1345_v4  ;;  %1294 = vmatmul.bf16.gmra.mxu0 %v1107_v5  ;;  %1383 = vmatmul.bf16.gmra.mxu1 %v1107_v5 }
 0x2cb   :  { %v1481_v11 = vmax.f32 %v1256_v3, %v1417_v6  ;;  %v1482_v58 = vmax.f32 %v1345_v4, %v1418_v10 }
 0x2cd   :  { %1545 = vst [vmem:[#allocation2 + $0xe0] sm:$0xff] %v1481_v11 }
 0x2ce   :  { %1546 = vst [vmem:[#allocation2 + $0xe8] sm:$0xff] %v1482_v58  ;;  %v1257_v12 = vpop.f32.mrf.mxu0  ;;  %v1346_v56 = vpop.f32.mrf.mxu1 }
 0x2cf   :  { %v1258_v22 = vadd.f32 %v1257_v12, %v2723_v8  ;;  %v1347_v15 = vadd.f32 %v1346_v56, %v2725_v9 }
 0x2d1   :  { %v1419_v16 = vmul.f32 0.01, %v1258_v22  ;;  %v1420_v17 = vmul.f32 0.01, %v1347_v15 }
 0x2d3   :  { %v1483_v18 = vmax.f32 %v1258_v22, %v1419_v16  ;;  %v1484_v19 = vmax.f32 %v1347_v15, %v1420_v17 }
 0x2d5   :  { %1547 = vst [vmem:[#allocation2 + $0xf0] sm:$0xff] %v1483_v18 }
 0x2d6   :  { %1548 = vst [vmem:[#allocation2 + $0xf8] sm:$0xff] %v1484_v19  ;;  %v1260_v20 = vpop.f32.mrf.mxu0  ;;  %v1349_v61 = vpop.f32.mrf.mxu1 }
 0x2d7   :  { %v1261_v7 = vadd.f32 %v1260_v20, %v2723_v8  ;;  %v1350_v25 = vadd.f32 %v1349_v61, %v2725_v9 }
 0x2d9   :  { %v1421_v24 = vmul.f32 0.01, %v1261_v7  ;;  %v1422_v35 = vmul.f32 0.01, %v1350_v25 }
 0x2db   :  { %v1485_v26 = vmax.f32 %v1261_v7, %v1421_v24  ;;  %v1486_v27 = vmax.f32 %v1350_v25, %v1422_v35 }
 0x2dd   :  { %1549 = vst [vmem:[#allocation2 + $0x100] sm:$0xff] %v1485_v26 }
 0x2de   :  { %1550 = vst [vmem:[#allocation2 + $0x108] sm:$0xff] %v1486_v27  ;;  %v1262_v28 = vpop.f32.mrf.mxu0  ;;  %v1351_v30 = vpop.f32.mrf.mxu1 }
 0x2df   :  { %v1263_v45 = vadd.f32 %v1262_v28, %v2723_v8  ;;  %v1352_v32 = vadd.f32 %v1351_v30, %v2725_v9 }
 0x2e1   :  { %v1423_v55 = vmul.f32 0.01, %v1263_v45  ;;  %v1424_v33 = vmul.f32 0.01, %v1352_v32 }
 0x2e3   :  { %v1487_v34 = vmax.f32 %v1263_v45, %v1423_v55  ;;  %v1488_v13 = vmax.f32 %v1352_v32, %v1424_v33 }
 0x2e5   :  { %1551 = vst [vmem:[#allocation2 + $0x110] sm:$0xff] %v1487_v34 }
 0x2e6   :  { %1552 = vst [vmem:[#allocation2 + $0x118] sm:$0xff] %v1488_v13  ;;  %v1265_v31 = vpop.f32.mrf.mxu0  ;;  %v1354_v36 = vpop.f32.mrf.mxu1 }
 0x2e7   :  { %v1266_v37 = vadd.f32 %v1265_v31, %v2723_v8  ;;  %v1355_v23 = vadd.f32 %v1354_v36, %v2725_v9 }
 0x2e9   :  { %v1425_v38 = vmul.f32 0.01, %v1266_v37  ;;  %v1426_v40 = vmul.f32 0.01, %v1355_v23 }
 0x2eb   :  { %v1489_v41 = vmax.f32 %v1266_v37, %v1425_v38  ;;  %v1490_v42 = vmax.f32 %v1355_v23, %v1426_v40 }
 0x2ed   :  { %1553 = vst [vmem:[#allocation2 + $0x120] sm:$0xff] %v1489_v41 }
 0x2ee   :  { %1554 = vst [vmem:[#allocation2 + $0x128] sm:$0xff] %v1490_v42  ;;  %v1267_v43 = vpop.f32.mrf.mxu0  ;;  %v1356_v44 = vpop.f32.mrf.mxu1 }
 0x2ef   :  { %v1268_v46 = vadd.f32 %v1267_v43, %v2723_v8  ;;  %v1357_v47 = vadd.f32 %v1356_v44, %v2725_v9 }
 0x2f1   :  { %v1427_v49 = vmul.f32 0.01, %v1268_v46  ;;  %v1428_v48 = vmul.f32 0.01, %v1357_v47 }
 0x2f3   :  { %v1491_v50 = vmax.f32 %v1268_v46, %v1427_v49  ;;  %v1492_v60 = vmax.f32 %v1357_v47, %v1428_v48 }
 0x2f5   :  { %1555 = vst [vmem:[#allocation2 + $0x130] sm:$0xff] %v1491_v50 }
 0x2f6   :  { %1556 = vst [vmem:[#allocation2 + $0x138] sm:$0xff] %v1492_v60  ;;  %v1270_v51 = vpop.f32.mrf.mxu0  ;;  %v1359_v52 = vpop.f32.mrf.mxu1 }
 0x2f7   :  { %v1271_v53 = vadd.f32 %v1270_v51, %v2723_v8  ;;  %v1360_v54 = vadd.f32 %v1359_v52, %v2725_v9 }
 0x2f9   :  { %v1429_v21 = vmul.f32 0.01, %v1271_v53  ;;  %v1430_v57 = vmul.f32 0.01, %v1360_v54 }
 0x2fb   :  { %v1493_v63 = vmax.f32 %v1271_v53, %v1429_v21  ;;  %v1494_v59 = vmax.f32 %v1360_v54, %v1430_v57 }
 0x2fd   :  { %1557 = vst [vmem:[#allocation2 + $0x140] sm:$0xff] %v1493_v63 }
 0x2fe   :  { %1558 = vst [vmem:[#allocation2 + $0x148] sm:$0xff] %v1494_v59  ;;  %v1272_v14 = vpop.f32.mrf.mxu0  ;;  %v1361_v62 = vpop.f32.mrf.mxu1 }
 0x2ff   :  { %v1273_v29 = vadd.f32 %v1272_v14, %v2723_v8  ;;  %v1362_v0 = vadd.f32 %v1361_v62, %v2725_v9 }
 0x301   :  { %v1431_v39 = vmul.f32 0.01, %v1273_v29  ;;  %v1432_v1 = vmul.f32 0.01, %v1362_v0 }
 0x303   :  { %v1495_v2 = vmax.f32 %v1273_v29, %v1431_v39  ;;  %v1496_v3 = vmax.f32 %v1362_v0, %v1432_v1 }
 0x305   :  { %1559 = vst [vmem:[#allocation2 + $0x150] sm:$0xff] %v1495_v2 }
 0x306   :  { %1560 = vst [vmem:[#allocation2 + $0x158] sm:$0xff] %v1496_v3  ;;  %v1275_v4 = vpop.f32.mrf.mxu0  ;;  %v1364_v5 = vpop.f32.mrf.mxu1 }
 0x307   :  { %v1276_v6 = vadd.f32 %v1275_v4, %v2723_v8  ;;  %v1365_v10 = vadd.f32 %v1364_v5, %v2725_v9 }
 0x309   :  { %v1433_v11 = vmul.f32 0.01, %v1276_v6  ;;  %v1434_v58 = vmul.f32 0.01, %v1365_v10 }
 0x30b   :  { %v1497_v12 = vmax.f32 %v1276_v6, %v1433_v11  ;;  %v1498_v56 = vmax.f32 %v1365_v10, %v1434_v58 }
 0x30d   :  { %1561 = vst [vmem:[#allocation2 + $0x160] sm:$0xff] %v1497_v12 }
 0x30e   :  { %1562 = vst [vmem:[#allocation2 + $0x168] sm:$0xff] %v1498_v56  ;;  %v1277_v22 = vpop.f32.mrf.mxu0  ;;  %v1366_v15 = vpop.f32.mrf.mxu1 }
 0x30f   :  { %v1278_v16 = vadd.f32 %v1277_v22, %v2723_v8  ;;  %v1367_v17 = vadd.f32 %v1366_v15, %v2725_v9 }
 0x311   :  { %v1435_v18 = vmul.f32 0.01, %v1278_v16  ;;  %v1436_v19 = vmul.f32 0.01, %v1367_v17 }
 0x313   :  { %v1499_v20 = vmax.f32 %v1278_v16, %v1435_v18  ;;  %v1500_v61 = vmax.f32 %v1367_v17, %v1436_v19 }
 0x315   :  { %1563 = vst [vmem:[#allocation2 + $0x170] sm:$0xff] %v1499_v20 }
 0x316   :  { %1564 = vst [vmem:[#allocation2 + $0x178] sm:$0xff] %v1500_v61  ;;  %v1280_v7 = vpop.f32.mrf.mxu0  ;;  %v1369_v25 = vpop.f32.mrf.mxu1 }
 0x317   :  { %v1281_v24 = vadd.f32 %v1280_v7, %v2723_v8  ;;  %v1370_v35 = vadd.f32 %v1369_v25, %v2725_v9 }
 0x319   :  { %v1437_v26 = vmul.f32 0.01, %v1281_v24  ;;  %v1438_v27 = vmul.f32 0.01, %v1370_v35 }
 0x31b   :  { %v1501_v28 = vmax.f32 %v1281_v24, %v1437_v26  ;;  %v1502_v30 = vmax.f32 %v1370_v35, %v1438_v27 }
 0x31d   :  { %1565 = vst [vmem:[#allocation2 + $0x180] sm:$0xff] %v1501_v28 }
 0x31e   :  { %1566 = vst [vmem:[#allocation2 + $0x188] sm:$0xff] %v1502_v30  ;;  %v1282_v45 = vpop.f32.mrf.mxu0  ;;  %v1371_v32 = vpop.f32.mrf.mxu1 }
 0x31f   :  { %v1283_v55 = vadd.f32 %v1282_v45, %v2723_v8  ;;  %v1372_v33 = vadd.f32 %v1371_v32, %v2725_v9 }
 0x321   :  { %v1439_v34 = vmul.f32 0.01, %v1283_v55  ;;  %v1440_v13 = vmul.f32 0.01, %v1372_v33 }
 0x323   :  { %v1503_v31 = vmax.f32 %v1283_v55, %v1439_v34  ;;  %v1504_v36 = vmax.f32 %v1372_v33, %v1440_v13 }
 0x325   :  { %1567 = vst [vmem:[#allocation2 + $0x190] sm:$0xff] %v1503_v31 }
 0x326   :  { %1568 = vst [vmem:[#allocation2 + $0x198] sm:$0xff] %v1504_v36  ;;  %v1285_v37 = vpop.f32.mrf.mxu0  ;;  %v1374_v23 = vpop.f32.mrf.mxu1 }
 0x327   :  { %v1286_v38 = vadd.f32 %v1285_v37, %v2723_v8  ;;  %v1375_v40 = vadd.f32 %v1374_v23, %v2725_v9 }
 0x329   :  { %v1441_v41 = vmul.f32 0.01, %v1286_v38  ;;  %v1442_v42 = vmul.f32 0.01, %v1375_v40 }
 0x32b   :  { %v1505_v43 = vmax.f32 %v1286_v38, %v1441_v41  ;;  %v1506_v44 = vmax.f32 %v1375_v40, %v1442_v42 }
 0x32d   :  { %1569 = vst [vmem:[#allocation2 + $0x1a0] sm:$0xff] %v1505_v43 }
 0x32e   :  { %1570 = vst [vmem:[#allocation2 + $0x1a8] sm:$0xff] %v1506_v44  ;;  %v1287_v46 = vpop.f32.mrf.mxu0  ;;  %v1376_v47 = vpop.f32.mrf.mxu1 }
 0x32f   :  { %v1288_v49 = vadd.f32 %v1287_v46, %v2723_v8  ;;  %v1377_v48 = vadd.f32 %v1376_v47, %v2725_v9 }
 0x331   :  { %v1443_v50 = vmul.f32 0.01, %v1288_v49  ;;  %v1444_v60 = vmul.f32 0.01, %v1377_v48 }
 0x333   :  { %v1507_v51 = vmax.f32 %v1288_v49, %v1443_v50  ;;  %v1508_v52 = vmax.f32 %v1377_v48, %v1444_v60 }
 0x335   :  { %1571 = vst [vmem:[#allocation2 + $0x1b0] sm:$0xff] %v1507_v51 }
 0x336   :  { %1572 = vst [vmem:[#allocation2 + $0x1b8] sm:$0xff] %v1508_v52  ;;  %v1290_v53 = vpop.f32.mrf.mxu0  ;;  %v1379_v54 = vpop.f32.mrf.mxu1 }
 0x337   :  { %v1291_v21 = vadd.f32 %v1290_v53, %v2723_v8  ;;  %v1380_v57 = vadd.f32 %v1379_v54, %v2725_v9 }
 0x339   :  { %v1445_v63 = vmul.f32 0.01, %v1291_v21  ;;  %v1446_v59 = vmul.f32 0.01, %v1380_v57 }
 0x33b   :  { %v1509_v14 = vmax.f32 %v1291_v21, %v1445_v63  ;;  %v1510_v62 = vmax.f32 %v1380_v57, %v1446_v59 }
 0x33d   :  { %1573 = vst [vmem:[#allocation2 + $0x1c0] sm:$0xff] %v1509_v14 }
 0x33e   :  { %1574 = vst [vmem:[#allocation2 + $0x1c8] sm:$0xff] %v1510_v62  ;;  %v1292_v29 = vpop.f32.mrf.mxu0  ;;  %v1381_v0 = vpop.f32.mrf.mxu1 }
 0x33f   :  { %v1293_v39 = vadd.f32 %v1292_v29, %v2723_v8  ;;  %v1382_v1 = vadd.f32 %v1381_v0, %v2725_v9 }
 0x341   :  { %v1447_v2 = vmul.f32 0.01, %v1293_v39  ;;  %v1448_v3 = vmul.f32 0.01, %v1382_v1 }
 0x343   :  { %v1511_v4 = vmax.f32 %v1293_v39, %v1447_v2  ;;  %v1512_v5 = vmax.f32 %v1382_v1, %v1448_v3 }
 0x345   :  { %1575 = vst [vmem:[#allocation2 + $0x1d0] sm:$0xff] %v1511_v4 }
 0x346   :  { %1576 = vst [vmem:[#allocation2 + $0x1d8] sm:$0xff] %v1512_v5  ;;  %v1295_v6 = vpop.f32.mrf.mxu0  ;;  %v1384_v10 = vpop.f32.mrf.mxu1 }
 0x347   :  { %v1296_v11 = vadd.f32 %v1295_v6, %v2723_v8  ;;  %v1385_v58 = vadd.f32 %v1384_v10, %v2725_v9 }
 0x349   :  { %v1449_v12 = vmul.f32 0.01, %v1296_v11  ;;  %v1450_v56 = vmul.f32 0.01, %v1385_v58 }
 0x34b   :  { %v1513_v22 = vmax.f32 %v1296_v11, %v1449_v12  ;;  %v1514_v15 = vmax.f32 %v1385_v58, %v1450_v56 }
 0x34d   :  { %1577 = vst [vmem:[#allocation2 + $0x1e0] sm:$0xff] %v1513_v22 }
 0x34e   :  { %1578 = vst [vmem:[#allocation2 + $0x1e8] sm:$0xff] %v1514_v15  ;;  %v1297_v16 = vpop.f32.mrf.mxu0  ;;  %v1386_v17 = vpop.f32.mrf.mxu1 }
 0x34f   :  { %v1298_v18 = vadd.f32 %v1297_v16, %v2723_v8  ;;  %v1387_v19 = vadd.f32 %v1386_v17, %v2725_v9 }
 0x351   :  { %v1451_v20 = vmul.f32 0.01, %v1298_v18  ;;  %v1452_v61 = vmul.f32 0.01, %v1387_v19 }
 0x353   :  { %v1515_v7 = vmax.f32 %v1298_v18, %v1451_v20  ;;  %v1516_v25 = vmax.f32 %v1387_v19, %v1452_v61 }
 0x355   :  { %1579 = vst [vmem:[#allocation2 + $0x1f0] sm:$0xff] %v1515_v7 }
 0x356   :  { %1580 = vst [vmem:[#allocation2 + $0x1f8] sm:$0xff] %v1516_v25 }
 0x357   :  { %1595 = dma.vmem_to_hbm [thread:$0]  %s1588_s21, 8192, %s1590_s24, [#allocation3], %s2053_s3, %s2053_s3, %s2054_s25  }
 0x358   :  { %2050 = dma.done.wait [#allocation3], 8192  }
 0x359   :  { %2051 = vsyncadd [#allocation3], 4294959104 }
 0x35a   :  { %1602 = vsyncpa [#allocation3], 1 }

</bundles_post_ra>
